<compile_context>
chip_gen: v6e
topology: v6e:2x2x1
jax: 0.10.0
libtpu: 0.0.40
codegen_flags: <defaults>
</compile_context>

<pallas_src>
import jax
import jax.numpy as jnp
from jax import lax
from jax.experimental import pallas as pl
from jax.experimental.pallas import tpu as pltpu


def _round_up(x, m):
    return ((x + m - 1) // m) * m


# ------------------------------------------------------------------ kernel ---
def processor_kernel(
    # inputs
    hn_in_ref, he_in_ref, src_ref, dst_ref,
    we_s_ref, we_d_ref, we_e_ref, be1_ref, we2_ref, be2_ref,
    wn_n_ref, wn_a_ref, bn1_ref, wn2_ref, bn2_ref,
    # outputs (used as resident state across the whole grid)
    hn_out_ref, he_out_ref,
    # scratch
    proj_s, proj_d, agg,
):
    layer = pl.program_id(0)
    et = pl.program_id(1)
    n_layers = pl.num_programs(0)
    n_et = pl.num_programs(1)
    n_pad = hn_out_ref.shape[0]
    tile_e = src_ref.shape[0]

    # ---- one-time copy of the graph features into the resident output blocks
    @pl.when(jnp.logical_and(layer == 0, et == 0))
    def _():
        hn_out_ref[...] = hn_in_ref[...]
        he_out_ref[...] = he_in_ref[...]

    # ---- per-layer prologue: project node features through the src/dst halves of the
    #      first edge-MLP weight once, and zero the aggregation accumulator.
    @pl.when(et == 0)
    def _():
        hn = hn_out_ref[...]
        proj_s[...] = jnp.dot(hn, we_s_ref[...], preferred_element_type=jnp.float32)
        proj_d[...] = jnp.dot(hn, we_d_ref[...], preferred_element_type=jnp.float32)
        agg[...] = jnp.zeros_like(agg)

    # ---------------- edge phase: this tile of edges ----------------
    idx_s = src_ref[...]                                   # [T, 1] int32 (-1 for padding)
    idx_d = dst_ref[...]                                   # [T, 1] int32 (-1 for padding)
    lane = lax.broadcasted_iota(jnp.int32, (tile_e, n_pad), 1)
    oh_s = (idx_s == lane).astype(jnp.float32)             # [T, N_pad] (all-zero row if padded)
    oh_d = (idx_d == lane).astype(jnp.float32)             # [T, N_pad]

    he_t = he_out_ref[et]                                  # [T, De_pad]

    # edge MLP (concat expressed as split-weight matmuls; src/dst parts pre-projected)
    e_hid = (
        jnp.dot(oh_s, proj_s[...], preferred_element_type=jnp.float32)
        + jnp.dot(oh_d, proj_d[...], preferred_element_type=jnp.float32)
        + jnp.dot(he_t, we_e_ref[...], preferred_element_type=jnp.float32)
        + be1_ref[...]
    )
    e_hid = jnp.maximum(e_hid, 0.0)
    e_new = (
        jnp.dot(e_hid, we2_ref[...], preferred_element_type=jnp.float32)
        + be2_ref[...]
        + he_t
    )
    he_out_ref[et] = e_new

    # scatter-add onto destination nodes: contract over the edge-tile axis directly.
    # Padded edges have idx_d == -1 -> all-zero one-hot rows -> contribute nothing.
    agg[...] += lax.dot_general(
        oh_d, e_new, (((0,), (0,)), ((), ())),
        preferred_element_type=jnp.float32,
    )

    # ---------------- node phase: after the last edge tile of this layer ----------------
    @pl.when(et == n_et - 1)
    def _():
        hn_cur = hn_out_ref[...]
        n_hid = (
            jnp.dot(hn_cur, wn_n_ref[...], preferred_element_type=jnp.float32)
            + jnp.dot(agg[...], wn_a_ref[...], preferred_element_type=jnp.float32)
            + bn1_ref[...]
        )
        n_hid = jnp.maximum(n_hid, 0.0)
        hn_out_ref[...] = (
            jnp.dot(n_hid, wn2_ref[...], preferred_element_type=jnp.float32)
            + bn2_ref[...]
            + hn_cur
        )


# ----------------------------------------------------------------- wrapper ---
def processor_forward(h_node, edge_index, h_edge, params, num_convs, tile_e=128):
    """Equivalent of Processor.forward: all `num_convs` layers fused in one pallas_call."""
    N, Dn = h_node.shape
    E, De = h_edge.shape
    f32 = jnp.float32

    DNp = _round_up(Dn, 128)         # lane-dense node feature dim
    DEp = _round_up(De, 128)         # lane-dense edge feature dim
    NP = _round_up(N, 128)           # one-hot lane / contraction dim
    EP = _round_up(E, tile_e)
    n_et = EP // tile_e

    # ---- pad features / indices (padded edges get index -1 -> all-zero one-hot rows)
    hn_p = jnp.zeros((NP, DNp), f32).at[:N, :Dn].set(h_node.astype(f32))
    he_p = jnp.zeros((EP, DEp), f32).at[:E, :De].set(h_edge.astype(f32))
    he_p = he_p.reshape(n_et, tile_e, DEp)
    src_p = jnp.full((EP, 1), -1, jnp.int32).at[:E, 0].set(edge_index[0].astype(jnp.int32))
    dst_p = jnp.full((EP, 1), -1, jnp.int32).at[:E, 0].set(edge_index[1].astype(jnp.int32))

    (we_s, we_d, we_e, be1, we2, be2, wn_n, wn_a, bn1, wn2, bn2) = params

    def pad2(w, r, c):
        return jnp.zeros((r, c), f32).at[: w.shape[0], : w.shape[1]].set(w.astype(f32))

    weights = (
        pad2(we_s, DNp, DEp), pad2(we_d, DNp, DEp), pad2(we_e, DEp, DEp),
        pad2(be1, 1, DEp), pad2(we2, DEp, DEp), pad2(be2, 1, DEp),
        pad2(wn_n, DNp, DNp), pad2(wn_a, DEp, DNp), pad2(bn1, 1, DNp),
        pad2(wn2, DNp, DNp), pad2(bn2, 1, DNp),
    )

    inputs = (hn_p, he_p, src_p, dst_p) + weights

    def const_spec(shape):
        zeros = (0,) * len(shape)
        return pl.BlockSpec(shape, lambda l, t, z=zeros: z)

    idx_spec = pl.BlockSpec((tile_e, 1), lambda l, t: (t, 0))

    in_specs = [
        const_spec(hn_p.shape),          # node features, loaded once
        const_spec(he_p.shape),          # edge features, loaded once
        idx_spec,                        # src indices (per edge tile)
        idx_spec,                        # dst indices (per edge tile)
    ] + [const_spec(w.shape) for w in weights]

    out_shape = (
        jax.ShapeDtypeStruct((NP, DNp), f32),
        jax.ShapeDtypeStruct((n_et, tile_e, DEp), f32),
    )
    out_specs = (const_spec((NP, DNp)), const_spec((n_et, tile_e, DEp)))

    hn_out, he_out = pl.pallas_call(
        processor_kernel,
        grid=(num_convs, n_et),
        in_specs=in_specs,
        out_specs=out_specs,
        out_shape=out_shape,
        scratch_shapes=[
            pltpu.VMEM((NP, DEp), f32),   # per-layer src-projected node features
            pltpu.VMEM((NP, DEp), f32),   # per-layer dst-projected node features
            pltpu.VMEM((NP, DEp), f32),   # per-layer aggregation accumulator
        ],
        compiler_params=pltpu.CompilerParams(
            dimension_semantics=("arbitrary", "arbitrary"),
        ),
    )(*inputs)

    return hn_out[:N, :Dn], he_out.reshape(EP, DEp)[:E, :De]


# -------------------------------------------------------------- reference ---
def processor_reference(h_node, edge_index, h_edge, params, num_convs):
    (we_s, we_d, we_e, be1, we2, be2, wn_n, wn_a, bn1, wn2, bn2) = params
    src_idx, dst_idx = edge_index[0], edge_index[1]
    N = h_node.shape[0]
    for _ in range(num_convs):
        h_src = h_node[src_idx]
        h_dst = h_node[dst_idx]
        e_hid = jnp.maximum(h_src @ we_s + h_dst @ we_d + h_edge @ we_e + be1, 0.0)
        e_new = e_hid @ we2 + be2 + h_edge
        agg = jnp.zeros((N, e_new.shape[1]), e_new.dtype).at[dst_idx].add(e_new)
        n_hid = jnp.maximum(h_node @ wn_n + agg @ wn_a + bn1, 0.0)
        h_node = n_hid @ wn2 + bn2 + h_node
        h_edge = e_new
    return h_node, h_edge


# ------------------------------------------------------------------- main ---
def init_params(key, node_dim, edge_dim):
    """Deterministic synthetic weights (MLP hidden size = output size)."""
    ks = jax.random.split(key, 11)

    def lin(k, fan_in, fan_out):
        scale = 1.0 / jnp.sqrt(jnp.float32(fan_in))
        return jax.random.uniform(k, (fan_in, fan_out), jnp.float32, -scale, scale)

    we_s = lin(ks[0], node_dim, edge_dim)
    we_d = lin(ks[1], node_dim, edge_dim)
    we_e = lin(ks[2], edge_dim, edge_dim)
    be1 = jax.random.uniform(ks[3], (1, edge_dim), jnp.float32, -0.1, 0.1)
    we2 = lin(ks[4], edge_dim, edge_dim)
    be2 = jax.random.uniform(ks[5], (1, edge_dim), jnp.float32, -0.1, 0.1)
    wn_n = lin(ks[6], node_dim, node_dim)
    wn_a = lin(ks[7], edge_dim, node_dim)
    bn1 = jax.random.uniform(ks[8], (1, node_dim), jnp.float32, -0.1, 0.1)
    wn2 = lin(ks[9], node_dim, node_dim)
    bn2 = jax.random.uniform(ks[10], (1, node_dim), jnp.float32, -0.1, 0.1)
    return (we_s, we_d, we_e, be1, we2, be2, wn_n, wn_a, bn1, wn2, bn2)


if __name__ == "__main__":
    num_convs = 2
    node_dim = 32
    edge_dim = 32
    num_nodes = 8
    num_edges = 16

    key = jax.random.PRNGKey(0)
    k_hn, k_he, k_ei, k_p = jax.random.split(key, 4)

    h_node = jax.random.normal(k_hn, (num_nodes, node_dim), jnp.float32)
    h_edge = jax.random.normal(k_he, (num_edges, edge_dim), jnp.float32)
    edge_index = jax.random.randint(k_ei, (2, num_edges), 0, num_nodes, jnp.int32)
    params = init_params(k_p, node_dim, edge_dim)

    out_node, out_edge = processor_forward(h_node, edge_index, h_edge, params, num_convs)
    out_node = jax.block_until_ready(out_node)
    out_edge = jax.block_until_ready(out_edge)

    ref_node, ref_edge = processor_reference(h_node, edge_index, h_edge, params, num_convs)
    assert jnp.allclose(out_node, ref_node, atol=2e-4, rtol=2e-4)
    assert jnp.allclose(out_edge, ref_edge, atol=2e-4, rtol=2e-4)

    print("KERNEL_OK")
</pallas_src>

<mosaic_0001>
module attributes {stable_mosaic.version = 11 : i64} {
  func.func @processor_kernel(%arg0: i32, %arg1: i32, %arg2: memref<128x128xf32, #tpu.memory_space<vmem>>, %arg3: memref<1x128x128xf32, #tpu.memory_space<vmem>>, %arg4: memref<128x1xi32, #tpu.memory_space<vmem>>, %arg5: memref<128x1xi32, #tpu.memory_space<vmem>>, %arg6: memref<128x128xf32, #tpu.memory_space<vmem>>, %arg7: memref<128x128xf32, #tpu.memory_space<vmem>>, %arg8: memref<128x128xf32, #tpu.memory_space<vmem>>, %arg9: memref<1x128xf32, #tpu.memory_space<vmem>>, %arg10: memref<128x128xf32, #tpu.memory_space<vmem>>, %arg11: memref<1x128xf32, #tpu.memory_space<vmem>>, %arg12: memref<128x128xf32, #tpu.memory_space<vmem>>, %arg13: memref<128x128xf32, #tpu.memory_space<vmem>>, %arg14: memref<1x128xf32, #tpu.memory_space<vmem>>, %arg15: memref<128x128xf32, #tpu.memory_space<vmem>>, %arg16: memref<1x128xf32, #tpu.memory_space<vmem>>, %arg17: memref<128x128xf32, #tpu.memory_space<vmem>>, %arg18: memref<1x128x128xf32, #tpu.memory_space<vmem>>, %arg19: memref<128x128xf32, #tpu.memory_space<vmem>>, %arg20: memref<128x128xf32, #tpu.memory_space<vmem>>, %arg21: memref<128x128xf32, #tpu.memory_space<vmem>>) attributes {dimension_semantics = [#tpu.dimension_semantics<arbitrary>, #tpu.dimension_semantics<arbitrary>], iteration_bounds = array<i64: 2, 1>, scalar_prefetch = 0 : i64, scratch_operands = 3 : i64, tpu.core_type = #tpu.core_type<tc>, window_params = [{pipeline_mode = #tpu.pipeline_mode<synchronous>, transform_indices = @transform_0, window_bounds = array<i64: 128, 128>}, {pipeline_mode = #tpu.pipeline_mode<synchronous>, transform_indices = @transform_1, window_bounds = array<i64: 1, 128, 128>}, {transform_indices = @transform_2, window_bounds = array<i64: 128, 1>}, {transform_indices = @transform_3, window_bounds = array<i64: 128, 1>}, {pipeline_mode = #tpu.pipeline_mode<synchronous>, transform_indices = @transform_4, window_bounds = array<i64: 128, 128>}, {pipeline_mode = #tpu.pipeline_mode<synchronous>, transform_indices = @transform_5, window_bounds = array<i64: 128, 128>}, {pipeline_mode = #tpu.pipeline_mode<synchronous>, transform_indices = @transform_6, window_bounds = array<i64: 128, 128>}, {pipeline_mode = #tpu.pipeline_mode<synchronous>, transform_indices = @transform_7, window_bounds = array<i64: 1, 128>}, {pipeline_mode = #tpu.pipeline_mode<synchronous>, transform_indices = @transform_8, window_bounds = array<i64: 128, 128>}, {pipeline_mode = #tpu.pipeline_mode<synchronous>, transform_indices = @transform_9, window_bounds = array<i64: 1, 128>}, {pipeline_mode = #tpu.pipeline_mode<synchronous>, transform_indices = @transform_10, window_bounds = array<i64: 128, 128>}, {pipeline_mode = #tpu.pipeline_mode<synchronous>, transform_indices = @transform_11, window_bounds = array<i64: 128, 128>}, {pipeline_mode = #tpu.pipeline_mode<synchronous>, transform_indices = @transform_12, window_bounds = array<i64: 1, 128>}, {pipeline_mode = #tpu.pipeline_mode<synchronous>, transform_indices = @transform_13, window_bounds = array<i64: 128, 128>}, {pipeline_mode = #tpu.pipeline_mode<synchronous>, transform_indices = @transform_14, window_bounds = array<i64: 1, 128>}, {pipeline_mode = #tpu.pipeline_mode<synchronous>, transform_indices = @transform_15, window_bounds = array<i64: 128, 128>}, {pipeline_mode = #tpu.pipeline_mode<synchronous>, transform_indices = @transform_16, window_bounds = array<i64: 1, 128, 128>}]} {
    %c0_i32 = arith.constant 0 : i32
    %0 = arith.cmpi eq, %arg0, %c0_i32 : i32
    %c0_i32_0 = arith.constant 0 : i32
    %1 = arith.cmpi eq, %arg1, %c0_i32_0 : i32
    %2 = arith.andi %0, %1 : i1
    %3 = arith.extui %2 : i1 to i32
    %c0_i32_1 = arith.constant 0 : i32
    %4 = arith.cmpi ne, %3, %c0_i32_1 : i32
    scf.if %4 {
      %c0_34 = arith.constant 0 : index
      %c0_35 = arith.constant 0 : index
      %52 = vector.load %arg2[%c0_34, %c0_35] : memref<128x128xf32, #tpu.memory_space<vmem>>, vector<128x128xf32>
      %c0_36 = arith.constant 0 : index
      %c0_37 = arith.constant 0 : index
      %53 = vector.load %arg17[%c0_36, %c0_37] : memref<128x128xf32, #tpu.memory_space<vmem>>, vector<128x128xf32>
      tpu.vector_store %arg17[%c0_36, %c0_37], %52 {strides = array<i32>} : memref<128x128xf32, #tpu.memory_space<vmem>>, vector<128x128xf32>,
      %c0_38 = arith.constant 0 : index
      %c0_39 = arith.constant 0 : index
      %c0_40 = arith.constant 0 : index
      %54 = vector.load %arg3[%c0_38, %c0_39, %c0_40] : memref<1x128x128xf32, #tpu.memory_space<vmem>>, vector<1x128x128xf32>
      %c0_41 = arith.constant 0 : index
      %c0_42 = arith.constant 0 : index
      %c0_43 = arith.constant 0 : index
      %55 = vector.load %arg18[%c0_41, %c0_42, %c0_43] : memref<1x128x128xf32, #tpu.memory_space<vmem>>, vector<1x128x128xf32>
      tpu.vector_store %arg18[%c0_41, %c0_42, %c0_43], %54 {strides = array<i32>} : memref<1x128x128xf32, #tpu.memory_space<vmem>>, vector<1x128x128xf32>,
    } else {
    }
    %c0_i32_2 = arith.constant 0 : i32
    %5 = arith.cmpi eq, %arg1, %c0_i32_2 : i32
    %6 = arith.extui %5 : i1 to i32
    %c0_i32_3 = arith.constant 0 : i32
    %7 = arith.cmpi ne, %6, %c0_i32_3 : i32
    scf.if %7 {
      %c0_34 = arith.constant 0 : index
      %c0_35 = arith.constant 0 : index
      %52 = vector.load %arg17[%c0_34, %c0_35] : memref<128x128xf32, #tpu.memory_space<vmem>>, vector<128x128xf32>
      %c0_36 = arith.constant 0 : index
      %c0_37 = arith.constant 0 : index
      %53 = vector.load %arg6[%c0_36, %c0_37] : memref<128x128xf32, #tpu.memory_space<vmem>>, vector<128x128xf32>
      %cst_38 = arith.constant dense<0.000000e+00> : vector<128x128xf32>
      %54 = tpu.matmul %52, %53, %cst_38 {dimension_numbers = #tpu.dot_dimension_numbers<[1], [0], [0], [1], [0, 0, 1, 1], [], []>} : vector<128x128xf32>, vector<128x128xf32>, vector<128x128xf32> -> vector<128x128xf32>
      %c0_39 = arith.constant 0 : index
      %c0_40 = arith.constant 0 : index
      %55 = vector.load %arg19[%c0_39, %c0_40] : memref<128x128xf32, #tpu.memory_space<vmem>>, vector<128x128xf32>
      tpu.vector_store %arg19[%c0_39, %c0_40], %54 {strides = array<i32>} : memref<128x128xf32, #tpu.memory_space<vmem>>, vector<128x128xf32>,
      %c0_41 = arith.constant 0 : index
      %c0_42 = arith.constant 0 : index
      %56 = vector.load %arg7[%c0_41, %c0_42] : memref<128x128xf32, #tpu.memory_space<vmem>>, vector<128x128xf32>
      %cst_43 = arith.constant dense<0.000000e+00> : vector<128x128xf32>
      %57 = tpu.matmul %52, %56, %cst_43 {dimension_numbers = #tpu.dot_dimension_numbers<[1], [0], [0], [1], [0, 0, 1, 1], [], []>} : vector<128x128xf32>, vector<128x128xf32>, vector<128x128xf32> -> vector<128x128xf32>
      %c0_44 = arith.constant 0 : index
      %c0_45 = arith.constant 0 : index
      %58 = vector.load %arg20[%c0_44, %c0_45] : memref<128x128xf32, #tpu.memory_space<vmem>>, vector<128x128xf32>
      tpu.vector_store %arg20[%c0_44, %c0_45], %57 {strides = array<i32>} : memref<128x128xf32, #tpu.memory_space<vmem>>, vector<128x128xf32>,
      %cst_46 = arith.constant 0.000000e+00 : f32
      %59 = vector.broadcast %cst_46 : f32 to vector<128x128xf32>
      %c0_47 = arith.constant 0 : index
      %c0_48 = arith.constant 0 : index
      %60 = vector.load %arg21[%c0_47, %c0_48] : memref<128x128xf32, #tpu.memory_space<vmem>>, vector<128x128xf32>
      tpu.vector_store %arg21[%c0_47, %c0_48], %59 {strides = array<i32>} : memref<128x128xf32, #tpu.memory_space<vmem>>, vector<128x128xf32>,
    } else {
    }
    %c0 = arith.constant 0 : index
    %c0_4 = arith.constant 0 : index
    %8 = vector.load %arg4[%c0, %c0_4] : memref<128x1xi32, #tpu.memory_space<vmem>>, vector<128x1xi32>
    %c0_5 = arith.constant 0 : index
    %c0_6 = arith.constant 0 : index
    %9 = vector.load %arg5[%c0_5, %c0_6] : memref<128x1xi32, #tpu.memory_space<vmem>>, vector<128x1xi32>
    %10 = tpu.iota {dimensions = array<i32: 1>} : vector<128x128xi32>
    %11 = vector.broadcast %8 : vector<128x1xi32> to vector<128x128xi32>
    %12 = arith.cmpi eq, %11, %10 : vector<128x128xi32>
    %13 = arith.extui %12 : vector<128x128xi1> to vector<128x128xi32>
    %14 = arith.sitofp %13 : vector<128x128xi32> to vector<128x128xf32>
    %15 = vector.broadcast %9 : vector<128x1xi32> to vector<128x128xi32>
    %16 = arith.cmpi eq, %15, %10 : vector<128x128xi32>
    %17 = arith.extui %16 : vector<128x128xi1> to vector<128x128xi32>
    %18 = arith.sitofp %17 : vector<128x128xi32> to vector<128x128xf32>
    %19 = arith.index_cast %arg1 : i32 to index
    %c0_7 = arith.constant 0 : index
    %c0_8 = arith.constant 0 : index
    %20 = vector.load %arg18[%19, %c0_7, %c0_8] : memref<1x128x128xf32, #tpu.memory_space<vmem>>, vector<1x128x128xf32>
    %21 = vector.shape_cast %20 : vector<1x128x128xf32> to vector<128x128xf32>
    %c0_9 = arith.constant 0 : index
    %c0_10 = arith.constant 0 : index
    %22 = vector.load %arg19[%c0_9, %c0_10] : memref<128x128xf32, #tpu.memory_space<vmem>>, vector<128x128xf32>
    %cst = arith.constant dense<0.000000e+00> : vector<128x128xf32>
    %23 = tpu.matmul %14, %22, %cst {dimension_numbers = #tpu.dot_dimension_numbers<[1], [0], [0], [1], [0, 0, 1, 1], [], []>} : vector<128x128xf32>, vector<128x128xf32>, vector<128x128xf32> -> vector<128x128xf32>
    %c0_11 = arith.constant 0 : index
    %c0_12 = arith.constant 0 : index
    %24 = vector.load %arg20[%c0_11, %c0_12] : memref<128x128xf32, #tpu.memory_space<vmem>>, vector<128x128xf32>
    %cst_13 = arith.constant dense<0.000000e+00> : vector<128x128xf32>
    %25 = tpu.matmul %18, %24, %cst_13 {dimension_numbers = #tpu.dot_dimension_numbers<[1], [0], [0], [1], [0, 0, 1, 1], [], []>} : vector<128x128xf32>, vector<128x128xf32>, vector<128x128xf32> -> vector<128x128xf32>
    %26 = arith.addf %23, %25 : vector<128x128xf32>
    %c0_14 = arith.constant 0 : index
    %c0_15 = arith.constant 0 : index
    %27 = vector.load %arg8[%c0_14, %c0_15] : memref<128x128xf32, #tpu.memory_space<vmem>>, vector<128x128xf32>
    %cst_16 = arith.constant dense<0.000000e+00> : vector<128x128xf32>
    %28 = tpu.matmul %21, %27, %cst_16 {dimension_numbers = #tpu.dot_dimension_numbers<[1], [0], [0], [1], [0, 0, 1, 1], [], []>} : vector<128x128xf32>, vector<128x128xf32>, vector<128x128xf32> -> vector<128x128xf32>
    %29 = arith.addf %26, %28 : vector<128x128xf32>
    %c0_17 = arith.constant 0 : index
    %c0_18 = arith.constant 0 : index
    %30 = vector.load %arg9[%c0_17, %c0_18] : memref<1x128xf32, #tpu.memory_space<vmem>>, vector<1x128xf32>
    %31 = vector.broadcast %30 : vector<1x128xf32> to vector<128x128xf32>
    %32 = arith.addf %29, %31 : vector<128x128xf32>
    %cst_19 = arith.constant 0.000000e+00 : f32
    %33 = vector.broadcast %cst_19 : f32 to vector<128x128xf32>
    %34 = arith.maximumf %32, %33 : vector<128x128xf32>
    %c0_20 = arith.constant 0 : index
    %c0_21 = arith.constant 0 : index
    %35 = vector.load %arg10[%c0_20, %c0_21] : memref<128x128xf32, #tpu.memory_space<vmem>>, vector<128x128xf32>
    %cst_22 = arith.constant dense<0.000000e+00> : vector<128x128xf32>
    %36 = tpu.matmul %34, %35, %cst_22 {dimension_numbers = #tpu.dot_dimension_numbers<[1], [0], [0], [1], [0, 0, 1, 1], [], []>} : vector<128x128xf32>, vector<128x128xf32>, vector<128x128xf32> -> vector<128x128xf32>
    %c0_23 = arith.constant 0 : index
    %c0_24 = arith.constant 0 : index
    %37 = vector.load %arg11[%c0_23, %c0_24] : memref<1x128xf32, #tpu.memory_space<vmem>>, vector<1x128xf32>
    %38 = vector.broadcast %37 : vector<1x128xf32> to vector<128x128xf32>
    %39 = arith.addf %36, %38 : vector<128x128xf32>
    %40 = arith.addf %39, %21 : vector<128x128xf32>
    %41 = arith.index_cast %arg1 : i32 to index
    %c0_25 = arith.constant 0 : index
    %c0_26 = arith.constant 0 : index
    %42 = vector.load %arg18[%41, %c0_25, %c0_26] : memref<1x128x128xf32, #tpu.memory_space<vmem>>, vector<1x128x128xf32>
    %43 = vector.shape_cast %42 : vector<1x128x128xf32> to vector<128x128xf32>
    %44 = vector.shape_cast %40 : vector<128x128xf32> to vector<1x128x128xf32>
    tpu.vector_store %arg18[%41, %c0_25, %c0_26], %44 {strides = array<i32>} : memref<1x128x128xf32, #tpu.memory_space<vmem>>, vector<1x128x128xf32>,
    %c0_27 = arith.constant 0 : index
    %c0_28 = arith.constant 0 : index
    %45 = vector.load %arg21[%c0_27, %c0_28] : memref<128x128xf32, #tpu.memory_space<vmem>>, vector<128x128xf32>
    %cst_29 = arith.constant dense<0.000000e+00> : vector<128x128xf32>
    %46 = tpu.matmul %18, %40, %cst_29 {dimension_numbers = #tpu.dot_dimension_numbers<[0], [0], [1], [1], [0, 1, 1, 1], [], []>} : vector<128x128xf32>, vector<128x128xf32>, vector<128x128xf32> -> vector<128x128xf32>
    %47 = arith.addf %45, %46 : vector<128x128xf32>
    %c0_30 = arith.constant 0 : index
    %c0_31 = arith.constant 0 : index
    %48 = vector.load %arg21[%c0_30, %c0_31] : memref<128x128xf32, #tpu.memory_space<vmem>>, vector<128x128xf32>
    tpu.vector_store %arg21[%c0_30, %c0_31], %47 {strides = array<i32>} : memref<128x128xf32, #tpu.memory_space<vmem>>, vector<128x128xf32>,
    %c0_i32_32 = arith.constant 0 : i32
    %49 = arith.cmpi eq, %arg1, %c0_i32_32 : i32
    %50 = arith.extui %49 : i1 to i32
    %c0_i32_33 = arith.constant 0 : i32
    %51 = arith.cmpi ne, %50, %c0_i32_33 : i32
    scf.if %51 {
      %c0_34 = arith.constant 0 : index
      %c0_35 = arith.constant 0 : index
      %52 = vector.load %arg17[%c0_34, %c0_35] : memref<128x128xf32, #tpu.memory_space<vmem>>, vector<128x128xf32>
      %c0_36 = arith.constant 0 : index
      %c0_37 = arith.constant 0 : index
      %53 = vector.load %arg12[%c0_36, %c0_37] : memref<128x128xf32, #tpu.memory_space<vmem>>, vector<128x128xf32>
      %cst_38 = arith.constant dense<0.000000e+00> : vector<128x128xf32>
      %54 = tpu.matmul %52, %53, %cst_38 {dimension_numbers = #tpu.dot_dimension_numbers<[1], [0], [0], [1], [0, 0, 1, 1], [], []>} : vector<128x128xf32>, vector<128x128xf32>, vector<128x128xf32> -> vector<128x128xf32>
      %c0_39 = arith.constant 0 : index
      %c0_40 = arith.constant 0 : index
      %55 = vector.load %arg21[%c0_39, %c0_40] : memref<128x128xf32, #tpu.memory_space<vmem>>, vector<128x128xf32>
      %c0_41 = arith.constant 0 : index
      %c0_42 = arith.constant 0 : index
      %56 = vector.load %arg13[%c0_41, %c0_42] : memref<128x128xf32, #tpu.memory_space<vmem>>, vector<128x128xf32>
      %cst_43 = arith.constant dense<0.000000e+00> : vector<128x128xf32>
      %57 = tpu.matmul %55, %56, %cst_43 {dimension_numbers = #tpu.dot_dimension_numbers<[1], [0], [0], [1], [0, 0, 1, 1], [], []>} : vector<128x128xf32>, vector<128x128xf32>, vector<128x128xf32> -> vector<128x128xf32>
      %58 = arith.addf %54, %57 : vector<128x128xf32>
      %c0_44 = arith.constant 0 : index
      %c0_45 = arith.constant 0 : index
      %59 = vector.load %arg14[%c0_44, %c0_45] : memref<1x128xf32, #tpu.memory_space<vmem>>, vector<1x128xf32>
      %60 = vector.broadcast %59 : vector<1x128xf32> to vector<128x128xf32>
      %61 = arith.addf %58, %60 : vector<128x128xf32>
      %cst_46 = arith.constant 0.000000e+00 : f32
      %62 = vector.broadcast %cst_46 : f32 to vector<128x128xf32>
      %63 = arith.maximumf %61, %62 : vector<128x128xf32>
      %c0_47 = arith.constant 0 : index
      %c0_48 = arith.constant 0 : index
      %64 = vector.load %arg15[%c0_47, %c0_48] : memref<128x128xf32, #tpu.memory_space<vmem>>, vector<128x128xf32>
      %cst_49 = arith.constant dense<0.000000e+00> : vector<128x128xf32>
      %65 = tpu.matmul %63, %64, %cst_49 {dimension_numbers = #tpu.dot_dimension_numbers<[1], [0], [0], [1], [0, 0, 1, 1], [], []>} : vector<128x128xf32>, vector<128x128xf32>, vector<128x128xf32> -> vector<128x128xf32>
      %c0_50 = arith.constant 0 : index
      %c0_51 = arith.constant 0 : index
      %66 = vector.load %arg16[%c0_50, %c0_51] : memref<1x128xf32, #tpu.memory_space<vmem>>, vector<1x128xf32>
      %67 = vector.broadcast %66 : vector<1x128xf32> to vector<128x128xf32>
      %68 = arith.addf %65, %67 : vector<128x128xf32>
      %69 = arith.addf %68, %52 : vector<128x128xf32>
      %c0_52 = arith.constant 0 : index
      %c0_53 = arith.constant 0 : index
      %70 = vector.load %arg17[%c0_52, %c0_53] : memref<128x128xf32, #tpu.memory_space<vmem>>, vector<128x128xf32>
      tpu.vector_store %arg17[%c0_52, %c0_53], %69 {strides = array<i32>} : memref<128x128xf32, #tpu.memory_space<vmem>>, vector<128x128xf32>,
    } else {
    }
    return
  }
  func.func @transform_0(%arg0: i32, %arg1: i32) -> (i32, i32) {
    %c0_i32 = arith.constant 0 : i32
    %c0_i32_0 = arith.constant 0 : i32
    %c0_i32_1 = arith.constant 0 : i32
    return %c0_i32, %c0_i32_0 : i32, i32
  }
  func.func @transform_1(%arg0: i32, %arg1: i32) -> (i32, i32, i32) {
    %c0_i32 = arith.constant 0 : i32
    %c0_i32_0 = arith.constant 0 : i32
    %c0_i32_1 = arith.constant 0 : i32
    %c0_i32_2 = arith.constant 0 : i32
    return %c0_i32, %c0_i32_0, %c0_i32_1 : i32, i32, i32
  }
  func.func @transform_2(%arg0: i32, %arg1: i32) -> (i32, i32) {
    %c0_i32 = arith.constant 0 : i32
    %c0_i32_0 = arith.constant 0 : i32
    return %arg1, %c0_i32 : i32, i32
  }
  func.func @transform_3(%arg0: i32, %arg1: i32) -> (i32, i32) {
    %c0_i32 = arith.constant 0 : i32
    %c0_i32_0 = arith.constant 0 : i32
    return %arg1, %c0_i32 : i32, i32
  }
  func.func @transform_4(%arg0: i32, %arg1: i32) -> (i32, i32) {
    %c0_i32 = arith.constant 0 : i32
    %c0_i32_0 = arith.constant 0 : i32
    %c0_i32_1 = arith.constant 0 : i32
    return %c0_i32, %c0_i32_0 : i32, i32
  }
  func.func @transform_5(%arg0: i32, %arg1: i32) -> (i32, i32) {
    %c0_i32 = arith.constant 0 : i32
    %c0_i32_0 = arith.constant 0 : i32
    %c0_i32_1 = arith.constant 0 : i32
    return %c0_i32, %c0_i32_0 : i32, i32
  }
  func.func @transform_6(%arg0: i32, %arg1: i32) -> (i32, i32) {
    %c0_i32 = arith.constant 0 : i32
    %c0_i32_0 = arith.constant 0 : i32
    %c0_i32_1 = arith.constant 0 : i32
    return %c0_i32, %c0_i32_0 : i32, i32
  }
  func.func @transform_7(%arg0: i32, %arg1: i32) -> (i32, i32) {
    %c0_i32 = arith.constant 0 : i32
    %c0_i32_0 = arith.constant 0 : i32
    %c0_i32_1 = arith.constant 0 : i32
    return %c0_i32, %c0_i32_0 : i32, i32
  }
  func.func @transform_8(%arg0: i32, %arg1: i32) -> (i32, i32) {
    %c0_i32 = arith.constant 0 : i32
    %c0_i32_0 = arith.constant 0 : i32
    %c0_i32_1 = arith.constant 0 : i32
    return %c0_i32, %c0_i32_0 : i32, i32
  }
  func.func @transform_9(%arg0: i32, %arg1: i32) -> (i32, i32) {
    %c0_i32 = arith.constant 0 : i32
    %c0_i32_0 = arith.constant 0 : i32
    %c0_i32_1 = arith.constant 0 : i32
    return %c0_i32, %c0_i32_0 : i32, i32
  }
  func.func @transform_10(%arg0: i32, %arg1: i32) -> (i32, i32) {
    %c0_i32 = arith.constant 0 : i32
    %c0_i32_0 = arith.constant 0 : i32
    %c0_i32_1 = arith.constant 0 : i32
    return %c0_i32, %c0_i32_0 : i32, i32
  }
  func.func @transform_11(%arg0: i32, %arg1: i32) -> (i32, i32) {
    %c0_i32 = arith.constant 0 : i32
    %c0_i32_0 = arith.constant 0 : i32
    %c0_i32_1 = arith.constant 0 : i32
    return %c0_i32, %c0_i32_0 : i32, i32
  }
  func.func @transform_12(%arg0: i32, %arg1: i32) -> (i32, i32) {
    %c0_i32 = arith.constant 0 : i32
    %c0_i32_0 = arith.constant 0 : i32
    %c0_i32_1 = arith.constant 0 : i32
    return %c0_i32, %c0_i32_0 : i32, i32
  }
  func.func @transform_13(%arg0: i32, %arg1: i32) -> (i32, i32) {
    %c0_i32 = arith.constant 0 : i32
    %c0_i32_0 = arith.constant 0 : i32
    %c0_i32_1 = arith.constant 0 : i32
    return %c0_i32, %c0_i32_0 : i32, i32
  }
  func.func @transform_14(%arg0: i32, %arg1: i32) -> (i32, i32) {
    %c0_i32 = arith.constant 0 : i32
    %c0_i32_0 = arith.constant 0 : i32
    %c0_i32_1 = arith.constant 0 : i32
    return %c0_i32, %c0_i32_0 : i32, i32
  }
  func.func @transform_15(%arg0: i32, %arg1: i32) -> (i32, i32) {
    %c0_i32 = arith.constant 0 : i32
    %c0_i32_0 = arith.constant 0 : i32
    %c0_i32_1 = arith.constant 0 : i32
    return %c0_i32, %c0_i32_0 : i32, i32
  }
  func.func @transform_16(%arg0: i32, %arg1: i32) -> (i32, i32, i32) {
    %c0_i32 = arith.constant 0 : i32
    %c0_i32_0 = arith.constant 0 : i32
    %c0_i32_1 = arith.constant 0 : i32
    %c0_i32_2 = arith.constant 0 : i32
    return %c0_i32, %c0_i32_0, %c0_i32_1 : i32, i32, i32
  }
}

</mosaic_0001>

<bundles_post_ra>
// kernel: tpu_custom_call.1
= control target key start
LH: loop header
LB: loop body
LE: loop exit
PB: predicated region body
PF: predicated region fallthrough
CT: control target
= control target key end

     0   :  { %s5472_s0 = inlined_call_operand.vmem [shape: f32[128,128], index: 0, kind: input, shape index: {}]   ;;  %s5473_s1 = inlined_call_operand.vmem [shape: f32[1,128,128], index: 1, kind: input, shape index: {}]   ;;  %s5474_s2 = inlined_call_operand.vmem [shape: s32[128,1], index: 2, kind: input, shape index: {}]   ;;  %s5475_s3 = inlined_call_operand.vmem [shape: s32[128,1], index: 3, kind: input, shape index: {}]   ;;  %s5476_s4 = inlined_call_operand.hbm [shape: f32[128,128], index: 4, kind: input, shape index: {}]   ;;  %s5477_s5 = inlined_call_operand.hbm [shape: f32[128,128], index: 5, kind: input, shape index: {}]   ;;  %s5478_s6 = inlined_call_operand.hbm [shape: f32[128,128], index: 6, kind: input, shape index: {}]   ;;  %s5479_s7 = inlined_call_operand.vmem [shape: f32[1,128], index: 7, kind: input, shape index: {}]   ;;  %s5480_s8 = inlined_call_operand.hbm [shape: f32[128,128], index: 8, kind: input, shape index: {}]   ;;  %s5481_s9 = inlined_call_operand.vmem [shape: f32[1,128], index: 9, kind: input, shape index: {}]   ;;  %s5482_s10 = inlined_call_operand.hbm [shape: f32[128,128], index: 10, kind: input, shape index: {}]   ;;  %s5483_s11 = inlined_call_operand.hbm [shape: f32[128,128], index: 11, kind: input, shape index: {}]   ;;  %s5484_s12 = inlined_call_operand.vmem [shape: f32[1,128], index: 12, kind: input, shape index: {}]   ;;  %s5485_s13 = inlined_call_operand.hbm [shape: f32[128,128], index: 13, kind: input, shape index: {}]   ;;  %s5486_s14 = inlined_call_operand.vmem [shape: f32[1,128], index: 14, kind: input, shape index: {}]   ;;  %s5487_s15 = inlined_call_operand.hbm [shape: f32[128,128], index: 15, kind: output, shape index: {0}]   ;;  %s5488_s16 = inlined_call_operand.hbm [shape: f32[1,128,128], index: 16, kind: output, shape index: {1}]  }
   0x1   :  { %5493 = sst [smem:[#allocation26_spill]] %s5472_s0 }
   0x2   :  { %5494 = sst [smem:[#allocation27_spill]] %s5477_s5 }
   0x3   :  { %5495 = sst [smem:[#allocation28_spill]] %s5480_s8 }
   0x4   :  { %5496 = sst [smem:[#allocation29_spill]] %s5483_s11 }
   0x5   :  { %5497 = sst [smem:[#allocation30_spill]] %s5487_s15 }
   0x6   :  { %22 = vsyncpa [#allocation6], 0 }
   0x7   :  { %23 = vsyncpa [#allocation9], 0 }
   0x8   :  { %24 = vsyncpa [#allocation12], 0 }
   0x9   :  { %25 = vsyncpa [#allocation15], 0 }
   0xa   :  { %26 = vsyncpa [#allocation7], 0 }
   0xb   :  { %27 = vsyncpa [#allocation19], 0  ;;  %s4549_s21 = smov 0   ;;  %s4551_s22 = smov 0  }
   0xc   :  { %s4553_s23 = smov 0  }
   0xd LB: > { %s5490_s24 = sadd.s32 4294967295, %s4446_s23   ;;  %p3078_p0 = scmp.ge.s32.totalorder %s4446_s23, 1  ;;  %s4446_s23 = sphi %s4553_s23, %s33_s23   ;;  %s4442_s22 = sphi %s4551_s22, %s5512_s22   ;;  %s4438_s21 = sphi %s4549_s21, %s5511_s21  }
   0xe   : > { %p417_p1 = scmp.lt.s32.totalorder %s4446_s23, 3  ;;  %p4569_p2 = scmp.eq.s32.totalorder %s5490_s24, 0 }
   0xf   : > { %s4448_s27 = smov [#allocation8]   ;;  %s4449_s29 = smov [#allocation11]  }
  0x10   : > { %p4573_p3 = pnand %p3078_p0, %p417_p1  ;;  %s466_s28 = sshll.u32 %s4448_s27, 4  ;;  %s467_s28 = int_to_ptr.vmem [resolvable:$true] %s466_s28 }
  0x11   : > { %s495_s30 = sshll.u32 %s4449_s29, 4  ;;  %s4450_s17 = smov [#allocation14]   ;;  %s4579_s30 = int_to_ptr.vmem [resolvable:$true] %s495_s30 }
  0x12   : > { %p4088_p4 = pneg %p4573_p3  ;;  %s524_s18 = sshll.u32 %s4450_s17, 4  ;;  %s4587_s18 = int_to_ptr.vmem [resolvable:$true] %s524_s18 }
  0x13   : > { %s4181_s20 = scalar_lea.vmem %s467_s28, 2048  ;;  %p4189_p10 = scmp.lt.s32.totalorder %s467_s28, %s467_s28 }
  0x14   : > { %p4583_p5 = pnand %p4569_p2, %p4088_p4  ;;  %p4182_p7 = scmp.ne.s32.totalorder %s467_s28, %s4181_s20 }
  0x15   : > { %p4190_p11 = scmp.lt.s32.totalorder %s4181_s20, %s4181_s20 }
  0x16   : > { %p4591_p6 = pneg %p4583_p5 }
  0x17   : > { %p4191_p12 = por %p4190_p11, %p4189_p10 }
  0x18   : > { %p4184_p8 = pnand %p4182_p7, %p4591_p6 }
  0x1a   : > { %p4185_p9 = pneg %p4184_p8 }
  0x1c   : > { %p4192_p13 = pnand %p4191_p12, %p4185_p9 }
  0x1e   : > { %4195 = shalt.err (!%p4192_p13)
}
  0x1f   : > { %s4451_s27 = smov 128   ;;  %s4452_s29 = smov 8  }
  0x20   : > { %s5502_s5 = sld [smem:[#allocation27_spill]]  ;;  %s4207_s15 = scalar_lea.vmem %s4579_s30, 2048 }
  0x21   : > { %p4208_p0 = scmp.ne.s32.totalorder %s4579_s30, %s4207_s15  ;;  %p4215_p7 = scmp.lt.s32.totalorder %s4579_s30, %s4579_s30 }
  0x22   : > { %p4216_p8 = scmp.lt.s32.totalorder %s4207_s15, %s4207_s15 }
  0x23   : > { %p4210_p1 = pnand %p4208_p0, %p4591_p6 }
  0x24   : > { %p4217_p9 = por %p4216_p8, %p4215_p7 }
  0x25   : > { %p4211_p4 = pneg %p4210_p1 }
  0x26   : > { %4094 = dma.hbm_to_vmem [thread:$0]  (!%p4583_p5), %s5502_s5, 2048, %s467_s28, [#allocation9], %s4451_s27, %s4451_s27, %s4452_s29  }
  0x27   : > { %p4218_p10 = pnand %p4217_p9, %p4211_p4 }
  0x29   : > { %4221 = shalt.err (!%p4218_p10)
}
  0x2a   : > { %s5503_s8 = sld [smem:[#allocation28_spill]]  ;;  %s4233_s28 = scalar_lea.vmem %s4587_s18, 2048 }
  0x2b   : > { %p4234_p11 = scmp.ne.s32.totalorder %s4587_s18, %s4233_s28  ;;  %p4241_p0 = scmp.lt.s32.totalorder %s4587_s18, %s4587_s18 }
  0x2c   : > { %p4242_p1 = scmp.lt.s32.totalorder %s4233_s28, %s4233_s28 }
  0x2d   : > { %p4236_p12 = pnand %p4234_p11, %p4591_p6 }
  0x2e   : > { %p4243_p4 = por %p4242_p1, %p4241_p0 }
  0x2f   : > { %p4237_p13 = pneg %p4236_p12 }
  0x30   : > { %4100 = dma.hbm_to_vmem [thread:$0]  (!%p4583_p5), %s5503_s8, 2048, %s4579_s30, [#allocation12], %s4451_s27, %s4451_s27, %s4452_s29  }
  0x31   : > { %p4244_p7 = pnand %p4243_p4, %p4237_p13 }
  0x33   : > { %4247 = shalt.err (!%p4244_p7)
}
  0x34   : > { %s5504_s11 = sld [smem:[#allocation29_spill]]  ;;  %s45_s30 = sadd.s32 1, %s4442_s22 }
  0x35   : > { %p47_p8 = scmp.ge.s32.totalorder %s45_s30, 2  ;;  %s4453_s20 = smov [#allocation5]  }
  0x36   : > { %s453_s24 = sshll.u32 %s4453_s20, 4  ;;  %s454_s24 = int_to_ptr.vmem [resolvable:$true] %s453_s24 }
  0x37   : > { %s5514_s30 = smov (%p47_p8, %s45_s30), 0  ;;  %s4259_s28 = scalar_lea.vmem %s454_s24, 2048 }
  0x38   : > { %p4260_p9 = scmp.ne.s32.totalorder %s454_s24, %s4259_s28  ;;  %p4267_p12 = scmp.lt.s32.totalorder %s454_s24, %s454_s24 }
  0x39   : > { %p4268_p13 = scmp.lt.s32.totalorder %s4259_s28, %s4259_s28 }
  0x3a   : > { %4106 = dma.hbm_to_vmem [thread:$0]  (!%p4583_p5), %s5504_s11, 2048, %s4587_s18, [#allocation15], %s4451_s27, %s4451_s27, %s4452_s29  }
  0x3b   : > { %p4262_p10 = pnand %p4260_p9, %p4591_p6  ;;  %p4269_p0 = por %p4268_p13, %p4267_p12 }
  0x3d   : > { %p4263_p11 = pneg %p4262_p10 }
  0x3f   : > { %p4270_p1 = pnand %p4269_p0, %p4263_p11 }
  0x41   : > { %4273 = shalt.err (!%p4270_p1)
}
  0x42   : > { %4091 = dma.hbm_to_vmem [thread:$0]  (!%p4583_p5), %s5476_s4, 2048, %s454_s24, [#allocation6], %s4451_s27, %s4451_s27, %s4452_s29  }
  0x43   : > { %s4454_s17 = smov [#allocation10]   ;;  %s4455_s5 = smov [#allocation13]  }
  0x44   : > { %s479_s20 = sshll.u32 %s4454_s17, 4  ;;  %s511_s8 = sshll.u32 %s4455_s5, 4  ;;  %s480_s20 = int_to_ptr.vmem [resolvable:$true] %s479_s20  ;;  %s512_s8 = int_to_ptr.vmem [resolvable:$true] %s511_s8 }
  0x45   : > { %s4285_s11 = scalar_lea.vmem %s480_s20, 2048  ;;  %p4293_p9 = scmp.lt.s32.totalorder %s480_s20, %s480_s20 }
  0x46   : > { %p4286_p4 = scmp.ne.s32.totalorder %s480_s20, %s4285_s11  ;;  %p4294_p10 = scmp.lt.s32.totalorder %s4285_s11, %s4285_s11 }
  0x48   : > { %p4288_p7 = pnand %p4286_p4, %p4591_p6  ;;  %p4295_p11 = por %p4294_p10, %p4293_p9 }
  0x4a   : > { %p4289_p8 = pneg %p4288_p7 }
  0x4c   : > { %p4296_p12 = pnand %p4295_p11, %p4289_p8 }
  0x4e   : > { %4299 = shalt.err (!%p4296_p12)
}
  0x4f   : > { %4097 = dma.hbm_to_vmem [thread:$0]  (!%p4583_p5), %s5478_s6, 2048, %s480_s20, [#allocation9], %s4451_s27, %s4451_s27, %s4452_s29  }
  0x50   : > { %s4311_s5 = scalar_lea.vmem %s512_s8, 2048  ;;  %p4319_p4 = scmp.lt.s32.totalorder %s512_s8, %s512_s8 }
  0x51   : > { %p4312_p13 = scmp.ne.s32.totalorder %s512_s8, %s4311_s5  ;;  %p4320_p7 = scmp.lt.s32.totalorder %s4311_s5, %s4311_s5 }
  0x53   : > { %p4314_p0 = pnand %p4312_p13, %p4591_p6  ;;  %p4321_p8 = por %p4320_p7, %p4319_p4 }
  0x55   : > { %p4315_p1 = pneg %p4314_p0 }
  0x57   : > { %p4322_p9 = pnand %p4321_p8, %p4315_p1 }
  0x59   : > { %4325 = shalt.err (!%p4322_p9)
}
  0x5a   : > { %4103 = dma.hbm_to_vmem [thread:$0]  (!%p4583_p5), %s5482_s10, 2048, %s512_s8, [#allocation12], %s4451_s27, %s4451_s27, %s4452_s29  }
  0x5b   : > { %s4456_s15 = smov [#allocation16]  }
  0x5c   : > { %s540_s17 = sshll.u32 %s4456_s15, 4  ;;  %s541_s17 = int_to_ptr.vmem [resolvable:$true] %s540_s17 }
  0x5d   : > { %s4337_s20 = scalar_lea.vmem %s541_s17, 2048  ;;  %p4345_p13 = scmp.lt.s32.totalorder %s541_s17, %s541_s17 }
  0x5e   : > { %p4338_p10 = scmp.ne.s32.totalorder %s541_s17, %s4337_s20  ;;  %p4346_p0 = scmp.lt.s32.totalorder %s4337_s20, %s4337_s20 }
  0x60   : > { %p4340_p11 = pnand %p4338_p10, %p4591_p6  ;;  %p4347_p1 = por %p4346_p0, %p4345_p13 }
  0x62   : > { %p4341_p12 = pneg %p4340_p11 }
  0x64   : > { %p4348_p4 = pnand %p4347_p1, %p4341_p12 }
  0x66   : > { %4351 = shalt.err (!%p4348_p4)
}
  0x67   : > { %4109 = dma.hbm_to_vmem [thread:$0]  (!%p4583_p5), %s5485_s13, 2048, %s541_s17, [#allocation15], %s4451_s27, %s4451_s27, %s4452_s29  }
  0x68   : > { %559 = sbr.rel (%p4573_p3) target bundleno = 1553 (0x611), region = 80 }
  0x6d   : > { %4413 = dma.done.wait (%p4569_p2), [#allocation6], 2048  }
  0x6e   : > { %4415 = vsyncadd (%p4569_p2), [#allocation6], 4294965248 }
  0x6f   : > { %4417 = dma.done.wait (%p4569_p2), [#allocation9], 4096  }
  0x70   : > { %4419 = vsyncadd (%p4569_p2), [#allocation9], 4294963200 }
  0x71   : > { %4421 = dma.done.wait (%p4569_p2), [#allocation12], 4096  }
  0x72   : > { %4423 = vsyncadd (%p4569_p2), [#allocation12], 4294963200 }
  0x73   : > { %4425 = dma.done.wait (%p4569_p2), [#allocation15], 4096  }
  0x74   : > { %4427 = vsyncadd (%p4569_p2), [#allocation15], 4294963200  ;;  %p645_p3 = scmp.eq.s32.totalorder %s4438_s21, 0 }
  0x75   : > { %s5505_s19 = sld [smem:[#allocation26_spill]] (%p645_p3)  ;;  %v683_v16 = vld [vmem:[%s5473_s1] sm:$0xff] (%p645_p3)  ;;  %v684_v17 = vld [vmem:[%s5473_s1 + $0x8] sm:$0xff] (%p645_p3)  ;;  %v685_v18 = vld [vmem:[%s5473_s1 + $0x10] sm:$0xff] (%p645_p3) }
  0x76   : > { %650 = sbr.rel (!%p645_p3) target bundleno = 135 (0x87), region = 112  ;;  %699 = vst [vmem:[#allocation18] sm:$0xff] (%p645_p3), %v683_v16  ;;  %700 = vst [vmem:[#allocation18 + $0x8] sm:$0xff] (%p645_p3), %v684_v17  ;;  %v686_v19 = vld [vmem:[%s5473_s1 + $0x18] sm:$0xff] (%p645_p3)  ;;  %v687_v20 = vld [vmem:[%s5473_s1 + $0x20] sm:$0xff] (%p645_p3) }
  0x77   : > { %701 = vst [vmem:[#allocation18 + $0x10] sm:$0xff] (%p645_p3), %v685_v18  ;;  %702 = vst [vmem:[#allocation18 + $0x18] sm:$0xff] (%p645_p3), %v686_v19  ;;  %v688_v21 = vld [vmem:[%s5473_s1 + $0x28] sm:$0xff] (%p645_p3)  ;;  %v689_v22 = vld [vmem:[%s5473_s1 + $0x30] sm:$0xff] (%p645_p3) }
  0x78   : > { %703 = vst [vmem:[#allocation18 + $0x20] sm:$0xff] (%p645_p3), %v687_v20  ;;  %v690_v23 = vld [vmem:[%s5473_s1 + $0x38] sm:$0xff] (%p645_p3)  ;;  %704 = vst [vmem:[#allocation18 + $0x28] sm:$0xff] (%p645_p3), %v688_v21  ;;  %v691_v24 = vld [vmem:[%s5473_s1 + $0x40] sm:$0xff] (%p645_p3) }
  0x79   : > { %705 = vst [vmem:[#allocation18 + $0x30] sm:$0xff] (%p645_p3), %v689_v22  ;;  %706 = vst [vmem:[#allocation18 + $0x38] sm:$0xff] (%p645_p3), %v690_v23  ;;  %v692_v25 = vld [vmem:[%s5473_s1 + $0x48] sm:$0xff] (%p645_p3)  ;;  %v693_v26 = vld [vmem:[%s5473_s1 + $0x50] sm:$0xff] (%p645_p3) }
  0x7a   : > { %707 = vst [vmem:[#allocation18 + $0x40] sm:$0xff] (%p645_p3), %v691_v24  ;;  %708 = vst [vmem:[#allocation18 + $0x48] sm:$0xff] (%p645_p3), %v692_v25  ;;  %v694_v27 = vld [vmem:[%s5473_s1 + $0x58] sm:$0xff] (%p645_p3)  ;;  %v695_v28 = vld [vmem:[%s5473_s1 + $0x60] sm:$0xff] (%p645_p3) }
  0x7b   : > { %v651_v0 = vld [vmem:[%s5505_s19] sm:$0xff]  ;;  %v652_v1 = vld [vmem:[%s5505_s19 + $0x8] sm:$0xff]  ;;  %v653_v2 = vld [vmem:[%s5505_s19 + $0x10] sm:$0xff]  ;;  %709 = vst [vmem:[#allocation18 + $0x50] sm:$0xff] %v693_v26 }
  0x7c   : > { %667 = vst [vmem:[#allocation17] sm:$0xff] %v651_v0  ;;  %668 = vst [vmem:[#allocation17 + $0x8] sm:$0xff] %v652_v1  ;;  %v654_v3 = vld [vmem:[%s5505_s19 + $0x18] sm:$0xff]  ;;  %v655_v4 = vld [vmem:[%s5505_s19 + $0x20] sm:$0xff] }
  0x7d   : > { %669 = vst [vmem:[#allocation17 + $0x10] sm:$0xff] %v653_v2  ;;  %v656_v5 = vld [vmem:[%s5505_s19 + $0x28] sm:$0xff]  ;;  %670 = vst [vmem:[#allocation17 + $0x18] sm:$0xff] %v654_v3  ;;  %v657_v6 = vld [vmem:[%s5505_s19 + $0x30] sm:$0xff] }
  0x7e   : > { %671 = vst [vmem:[#allocation17 + $0x20] sm:$0xff] %v655_v4  ;;  %672 = vst [vmem:[#allocation17 + $0x28] sm:$0xff] %v656_v5  ;;  %v658_v7 = vld [vmem:[%s5505_s19 + $0x38] sm:$0xff]  ;;  %v659_v8 = vld [vmem:[%s5505_s19 + $0x40] sm:$0xff] }
  0x7f   : > { %673 = vst [vmem:[#allocation17 + $0x30] sm:$0xff] %v657_v6  ;;  %674 = vst [vmem:[#allocation17 + $0x38] sm:$0xff] %v658_v7  ;;  %v660_v9 = vld [vmem:[%s5505_s19 + $0x48] sm:$0xff]  ;;  %v661_v10 = vld [vmem:[%s5505_s19 + $0x50] sm:$0xff] }
  0x80   : > { %675 = vst [vmem:[#allocation17 + $0x40] sm:$0xff] %v659_v8  ;;  %v662_v11 = vld [vmem:[%s5505_s19 + $0x58] sm:$0xff]  ;;  %676 = vst [vmem:[#allocation17 + $0x48] sm:$0xff] %v660_v9  ;;  %v663_v12 = vld [vmem:[%s5505_s19 + $0x60] sm:$0xff] }
  0x81   : > { %677 = vst [vmem:[#allocation17 + $0x50] sm:$0xff] %v661_v10  ;;  %678 = vst [vmem:[#allocation17 + $0x58] sm:$0xff] %v662_v11  ;;  %v664_v13 = vld [vmem:[%s5505_s19 + $0x68] sm:$0xff]  ;;  %v665_v14 = vld [vmem:[%s5505_s19 + $0x70] sm:$0xff] }
  0x82   : > { %679 = vst [vmem:[#allocation17 + $0x60] sm:$0xff] %v663_v12  ;;  %680 = vst [vmem:[#allocation17 + $0x68] sm:$0xff] %v664_v13  ;;  %v666_v15 = vld [vmem:[%s5505_s19 + $0x78] sm:$0xff]  ;;  %v696_v29 = vld [vmem:[%s5473_s1 + $0x68] sm:$0xff] }
  0x83   : > { %681 = vst [vmem:[#allocation17 + $0x70] sm:$0xff] %v665_v14  ;;  %682 = vst [vmem:[#allocation17 + $0x78] sm:$0xff] %v666_v15  ;;  %v697_v30 = vld [vmem:[%s5473_s1 + $0x70] sm:$0xff]  ;;  %v698_v31 = vld [vmem:[%s5473_s1 + $0x78] sm:$0xff] }
  0x84   : > { %710 = vst [vmem:[#allocation18 + $0x58] sm:$0xff] %v694_v27  ;;  %711 = vst [vmem:[#allocation18 + $0x60] sm:$0xff] %v695_v28 }
  0x85   : > { %712 = vst [vmem:[#allocation18 + $0x68] sm:$0xff] %v696_v29  ;;  %713 = vst [vmem:[#allocation18 + $0x70] sm:$0xff] %v697_v30 }
  0x86   : > { %714 = vst [vmem:[#allocation18 + $0x78] sm:$0xff] %v698_v31 }
  0x87 PF: > { %v749_v32 = vld [vmem:[#allocation5 + $0x78] sm:$0xff]  ;;  %v748_v34 = vld [vmem:[#allocation5 + $0x70] sm:$0xff]  ;;  %v747_v36 = vld [vmem:[#allocation5 + $0x68] sm:$0xff]  ;;  %v4457_v7 = vmov 0   ;;  %s5508_s8 = sadd.s32 4294967295, %s4446_s23   ;;  %s4460_s0 = smov [#allocation18]  }
  0x88   : > { %v926_v33 = vld [vmem:[#allocation8 + $0x78] sm:$0xff]  ;;  %3492 = vmatprep.subr.mxu0 %v749_v32  ;;  %v925_v35 = vld [vmem:[#allocation8 + $0x70] sm:$0xff]  ;;  %v924_v37 = vld [vmem:[#allocation8 + $0x68] sm:$0xff]  ;;  %4168 = vset.pattern.permute.xlu0 %v4457_v7  ;;  %p5394_p2 = scmp.eq.s32.totalorder %s5508_s8, 1  ;;  %s2926_s27 = sshll.u32 %s4460_s0, 4  ;;  %s2927_s27 = int_to_ptr.vmem [resolvable:$true] %s2926_s27 }
  0x89   : > { %3548 = vmatprep.subr.mxu1 %v926_v33  ;;  %3493 = vmatpush3.msra.mxu0 %v749_v32  ;;  %v746_v38 = vld [vmem:[#allocation5 + $0x60] sm:$0xff]  ;;  %v745_v40 = vld [vmem:[#allocation5 + $0x58] sm:$0xff]  ;;  %v744_v42 = vld [vmem:[#allocation5 + $0x50] sm:$0xff]  ;;  %s4352_s29 = scalar_lea.vmem %s2927_s27, 2048  ;;  %p4359_p8 = scmp.lt.s32.totalorder %s2927_s27, %s2927_s27 }
  0x8a   : > { %3549 = vmatpush3.msra.mxu1 %v926_v33  ;;  %3494 = vmatprep.subr.mxu0 %v748_v34  ;;  %v923_v39 = vld [vmem:[#allocation8 + $0x60] sm:$0xff]  ;;  %v922_v41 = vld [vmem:[#allocation8 + $0x58] sm:$0xff]  ;;  %v921_v43 = vld [vmem:[#allocation8 + $0x50] sm:$0xff]  ;;  %p4353_p5 = scmp.ne.s32.totalorder %s2927_s27, %s4352_s29  ;;  %p4360_p9 = scmp.lt.s32.totalorder %s4352_s29, %s4352_s29 }
  0x8b   : > { %3550 = vmatprep.subr.mxu1 %v925_v35  ;;  %3495 = vmatpush3.msra.mxu0 %v748_v34  ;;  %v743_v44 = vld [vmem:[#allocation5 + $0x48] sm:$0xff]  ;;  %v742_v46 = vld [vmem:[#allocation5 + $0x40] sm:$0xff]  ;;  %v741_v48 = vld [vmem:[#allocation5 + $0x38] sm:$0xff] }
  0x8c   : > { %3551 = vmatpush3.msra.mxu1 %v925_v35  ;;  %3496 = vmatprep.subr.mxu0 %v747_v36  ;;  %v920_v45 = vld [vmem:[#allocation8 + $0x48] sm:$0xff]  ;;  %v919_v47 = vld [vmem:[#allocation8 + $0x40] sm:$0xff]  ;;  %v918_v49 = vld [vmem:[#allocation8 + $0x38] sm:$0xff]  ;;  %p4354_p6 = pnand %p4353_p5, %p5394_p2  ;;  %p4361_p10 = por %p4360_p9, %p4359_p8 }
  0x8d   : > { %3552 = vmatprep.subr.mxu1 %v924_v37  ;;  %3497 = vmatpush3.msra.mxu0 %v747_v36  ;;  %v740_v50 = vld [vmem:[#allocation5 + $0x30] sm:$0xff]  ;;  %v739_v52 = vld [vmem:[#allocation5 + $0x28] sm:$0xff]  ;;  %v738_v54 = vld [vmem:[#allocation5 + $0x20] sm:$0xff] }
  0x8e   : > { %3553 = vmatpush3.msra.mxu1 %v924_v37  ;;  %3498 = vmatprep.subr.mxu0 %v746_v38  ;;  %v917_v51 = vld [vmem:[#allocation8 + $0x30] sm:$0xff]  ;;  %v916_v53 = vld [vmem:[#allocation8 + $0x28] sm:$0xff]  ;;  %v915_v55 = vld [vmem:[#allocation8 + $0x20] sm:$0xff]  ;;  %p4355_p7 = pneg %p4354_p6 }
  0x8f   : > { %3554 = vmatprep.subr.mxu1 %v923_v39  ;;  %3499 = vmatpush3.msra.mxu0 %v746_v38  ;;  %v737_v56 = vld [vmem:[#allocation5 + $0x18] sm:$0xff]  ;;  %v736_v58 = vld [vmem:[#allocation5 + $0x10] sm:$0xff]  ;;  %v735_v60 = vld [vmem:[#allocation5 + $0x8] sm:$0xff] }
  0x90   : > { %3555 = vmatpush3.msra.mxu1 %v923_v39  ;;  %3500 = vmatprep.subr.mxu0 %v745_v40  ;;  %v914_v57 = vld [vmem:[#allocation8 + $0x18] sm:$0xff]  ;;  %v913_v59 = vld [vmem:[#allocation8 + $0x10] sm:$0xff]  ;;  %v912_v61 = vld [vmem:[#allocation8 + $0x8] sm:$0xff]  ;;  %p4362_p11 = pnand %p4361_p10, %p4355_p7 }
  0x91   : > { %3556 = vmatprep.subr.mxu1 %v922_v41  ;;  %3501 = vmatpush3.msra.mxu0 %v745_v40  ;;  %v734_v62 = vld [vmem:[#allocation5] sm:$0xff]  ;;  %v719_v1 = vld [vmem:[#allocation17 + $0x8] sm:$0xff]  ;;  %v720_v2 = vld [vmem:[#allocation17 + $0x10] sm:$0xff] }
  0x92   : > { %3557 = vmatpush3.msra.mxu1 %v922_v41  ;;  %3502 = vmatprep.subr.mxu0 %v744_v42  ;;  %v911_v63 = vld [vmem:[#allocation8] sm:$0xff]  ;;  %v1122_v4 = vld [vmem:[%s5475_s3 + $0x10] sm:$0xff]  ;;  %v721_v5 = vld [vmem:[#allocation17 + $0x18] sm:$0xff] }
  0x93   : > { %3558 = vmatprep.subr.mxu1 %v921_v43  ;;  %3503 = vmatpush3.msra.mxu0 %v744_v42  ;;  %v718_v0 = vld [vmem:[#allocation17] sm:$0xff]  ;;  %v1121_v8 = vld [vmem:[%s5475_s3 + $0x8] sm:$0xff]  ;;  %v1123_v9 = vld [vmem:[%s5475_s3 + $0x18] sm:$0xff] }
  0x94   : > { %3559 = vmatpush3.msra.mxu1 %v921_v43  ;;  %3504 = vmatprep.subr.mxu0 %v743_v44  ;;  %v1120_v3 = vld [vmem:[%s5475_s3] sm:$0xff]  ;;  %v723_v10 = vld [vmem:[#allocation17 + $0x28] sm:$0xff]  ;;  %v724_v11 = vld [vmem:[#allocation17 + $0x30] sm:$0xff] }
  0x95   : > { %3560 = vmatprep.subr.mxu1 %v920_v45  ;;  %3505 = vmatpush3.msra.mxu0 %v743_v44  ;;  %v722_v6 = vld [vmem:[#allocation17 + $0x20] sm:$0xff]  ;;  %v1125_v13 = vld [vmem:[%s5475_s3 + $0x28] sm:$0xff]  ;;  %v725_v14 = vld [vmem:[#allocation17 + $0x38] sm:$0xff] }
  0x96   : > { %3561 = vmatpush3.msra.mxu1 %v920_v45  ;;  %3506 = vmatprep.subr.mxu0 %v742_v46  ;;  %v1124_v12 = vld [vmem:[%s5475_s3 + $0x20] sm:$0xff]  ;;  %v1126_v16 = vld [vmem:[%s5475_s3 + $0x30] sm:$0xff]  ;;  %v1127_v17 = vld [vmem:[%s5475_s3 + $0x38] sm:$0xff] }
  0x97   : > { %3562 = vmatprep.subr.mxu1 %v919_v47  ;;  %3507 = vmatpush3.msra.mxu0 %v742_v46  ;;  %v726_v15 = vld [vmem:[#allocation17 + $0x40] sm:$0xff]  ;;  %v727_v18 = vld [vmem:[#allocation17 + $0x48] sm:$0xff]  ;;  %v728_v19 = vld [vmem:[#allocation17 + $0x50] sm:$0xff] }
  0x98   : > { %3563 = vmatpush3.msra.mxu1 %v919_v47  ;;  %3508 = vmatprep.subr.mxu0 %v741_v48  ;;  %v1128_v20 = vld [vmem:[%s5475_s3 + $0x40] sm:$0xff]  ;;  %v1129_v21 = vld [vmem:[%s5475_s3 + $0x48] sm:$0xff]  ;;  %v729_v22 = vld [vmem:[#allocation17 + $0x58] sm:$0xff] }
  0x99   : > { %3564 = vmatprep.subr.mxu1 %v918_v49  ;;  %3509 = vmatpush3.msra.mxu0 %v741_v48  ;;  %v730_v23 = vld [vmem:[#allocation17 + $0x60] sm:$0xff]  ;;  %v1130_v24 = vld [vmem:[%s5475_s3 + $0x50] sm:$0xff]  ;;  %v1131_v25 = vld [vmem:[%s5475_s3 + $0x58] sm:$0xff] }
  0x9a   : > { %3565 = vmatpush3.msra.mxu1 %v918_v49  ;;  %3510 = vmatprep.subr.mxu0 %v740_v50  ;;  %v731_v26 = vld [vmem:[#allocation17 + $0x68] sm:$0xff]  ;;  %v732_v27 = vld [vmem:[#allocation17 + $0x70] sm:$0xff]  ;;  %v1132_v28 = vld [vmem:[%s5475_s3 + $0x60] sm:$0xff]  ;;  %v1136_v49 = vlaneseq }
  0x9b   : > { %3566 = vmatprep.subr.mxu1 %v917_v51  ;;  %3511 = vmatpush3.msra.mxu0 %v740_v50  ;;  %v1133_v29 = vld [vmem:[%s5475_s3 + $0x68] sm:$0xff]  ;;  %v733_v30 = vld [vmem:[#allocation17 + $0x78] sm:$0xff]  ;;  %v1134_v31 = vld [vmem:[%s5475_s3 + $0x70] sm:$0xff] }
  0x9c   : > { %3567 = vmatpush3.msra.mxu1 %v917_v51  ;;  %3512 = vmatprep.subr.mxu0 %v739_v52  ;;  %v1135_v32 = vld [vmem:[%s5475_s3 + $0x78] sm:$0xff]  ;;  %v1104_v33 = vld [vmem:[%s5474_s2] sm:$0xff]  ;;  %v1105_v34 = vld [vmem:[%s5474_s2 + $0x8] sm:$0xff]  ;;  %v4889_v50 = vand.u32 127, %v1136_v49 }
  0x9d   : > { %3568 = vmatprep.subr.mxu1 %v916_v53  ;;  %3513 = vmatpush3.msra.mxu0 %v739_v52  ;;  %v1106_v35 = vld [vmem:[%s5474_s2 + $0x10] sm:$0xff]  ;;  %v1107_v36 = vld [vmem:[%s5474_s2 + $0x18] sm:$0xff]  ;;  %v1108_v37 = vld [vmem:[%s5474_s2 + $0x20] sm:$0xff]  ;;  %v4458_v52 = vmov 0.0  }
  0x9e   : > { %3569 = vmatpush3.msra.mxu1 %v916_v53  ;;  %3514 = vmatprep.subr.mxu0 %v738_v54  ;;  %v1109_v38 = vld [vmem:[%s5474_s2 + $0x28] sm:$0xff]  ;;  %v1110_v39 = vld [vmem:[%s5474_s2 + $0x30] sm:$0xff]  ;;  %v1111_v40 = vld [vmem:[%s5474_s2 + $0x38] sm:$0xff] }
  0x9f   : > { %3570 = vmatprep.subr.mxu1 %v915_v55  ;;  %3515 = vmatpush3.msra.mxu0 %v738_v54  ;;  %v1112_v41 = vld [vmem:[%s5474_s2 + $0x40] sm:$0xff]  ;;  %v1113_v42 = vld [vmem:[%s5474_s2 + $0x48] sm:$0xff]  ;;  %v1114_v43 = vld [vmem:[%s5474_s2 + $0x50] sm:$0xff] }
  0xa0   : > { %3571 = vmatpush3.msra.mxu1 %v915_v55  ;;  %3516 = vmatprep.subr.mxu0 %v737_v56  ;;  %v1115_v44 = vld [vmem:[%s5474_s2 + $0x58] sm:$0xff]  ;;  %v1116_v45 = vld [vmem:[%s5474_s2 + $0x60] sm:$0xff]  ;;  %v1117_v46 = vld [vmem:[%s5474_s2 + $0x68] sm:$0xff]  ;;  %v4459_v55 = vmov 1.0  }
  0xa1   : > { %3572 = vmatprep.subr.mxu1 %v914_v57  ;;  %3517 = vmatpush3.msra.mxu0 %v737_v56  ;;  %v1118_v47 = vld [vmem:[%s5474_s2 + $0x70] sm:$0xff]  ;;  %v1119_v48 = vld [vmem:[%s5474_s2 + $0x78] sm:$0xff] }
  0xa2   : > { %3573 = vmatpush3.msra.mxu1 %v914_v57  ;;  %3518 = vmatprep.subr.mxu0 %v736_v58 }
  0xa3   : > { %3574 = vmatprep.subr.mxu1 %v913_v59  ;;  %3519 = vmatpush3.msra.mxu0 %v736_v58 }
  0xa4   : > { %3575 = vmatpush3.msra.mxu1 %v913_v59  ;;  %3520 = vmatprep.subr.mxu0 %v735_v60 }
  0xa5   : > { %3576 = vmatprep.subr.mxu1 %v912_v61  ;;  %3521 = vmatpush3.msra.mxu0 %v735_v60 }
  0xa6   : > { %3577 = vmatpush3.msra.mxu1 %v912_v61  ;;  %3522 = vmatprep.subr.mxu0 %v734_v62 }
  0xa7   : > { %3578 = vmatprep.subr.mxu1 %v911_v63  ;;  %3523 = vmatpush3.msra.mxu0 %v734_v62 }
  0xa8   : > { %3524 = vmatprep.mubr.f32.mxu0 %v718_v0  ;;  %3579 = vmatpush3.msra.mxu1 %v911_v63 }
  0xa9   : > { %3580 = vmatprep.mubr.f32.mxu1 %v718_v0  ;;  %3525 = vmatmul.mubr.f32.vlgmr.msra.gmra.mxu0 %v719_v1 }
  0xaa   : > { %3581 = vmatmul.mubr.f32.vlgmr.msra.gmra.mxu1 %v719_v1  ;;  %3527 = vmatprep.mubr.f32.mxu0 %v720_v2 }
  0xab   : > { %3583 = vmatprep.mubr.f32.mxu1 %v720_v2  ;;  %4169 = vset.pattern.permute.xlu1 %v4457_v7 }
  0xac   : > { %1235 = vperm.xlu0 %4168, %v1120_v3   ;;  %1241 = vperm.xlu1 %4169, %v1122_v4  }
  0xad   : > { %3528 = vmatmul.mubr.f32.gmra.mxu0 %v721_v5 }
  0xae   : > { %3584 = vmatmul.mubr.f32.gmra.mxu1 %v721_v5  ;;  %3530 = vmatprep.mubr.f32.mxu0 %v722_v6 }
  0xaf   : > { %3586 = vmatprep.mubr.f32.mxu1 %v722_v6 }
  0xb0   : > { %1238 = vperm.xlu0 %4168, %v1121_v8   ;;  %1244 = vperm.xlu1 %4169, %v1123_v9  }
  0xb1   : > { %3531 = vmatmul.mubr.f32.gmra.mxu0 %v723_v10 }
  0xb2   : > { %3587 = vmatmul.mubr.f32.gmra.mxu1 %v723_v10  ;;  %3533 = vmatprep.mubr.f32.mxu0 %v724_v11 }
  0xb3   : > { %3589 = vmatprep.mubr.f32.mxu1 %v724_v11 }
  0xb4   : > { %1247 = vperm.xlu0 %4168, %v1124_v12   ;;  %1250 = vperm.xlu1 %4169, %v1125_v13  }
  0xb5   : > { %3534 = vmatmul.mubr.f32.gmra.mxu0 %v725_v14 }
  0xb6   : > { %3590 = vmatmul.mubr.f32.gmra.mxu1 %v725_v14  ;;  %3536 = vmatprep.mubr.f32.mxu0 %v726_v15 }
  0xb7   : > { %3592 = vmatprep.mubr.f32.mxu1 %v726_v15 }
  0xb8   : > { %1253 = vperm.xlu0 %4168, %v1126_v16   ;;  %1256 = vperm.xlu1 %4169, %v1127_v17  }
  0xb9   : > { %3537 = vmatmul.mubr.f32.gmra.mxu0 %v727_v18 }
  0xba   : > { %3593 = vmatmul.mubr.f32.gmra.mxu1 %v727_v18  ;;  %3539 = vmatprep.mubr.f32.mxu0 %v728_v19 }
  0xbb   : > { %3595 = vmatprep.mubr.f32.mxu1 %v728_v19 }
  0xbc   : > { %1259 = vperm.xlu0 %4168, %v1128_v20   ;;  %1262 = vperm.xlu1 %4169, %v1129_v21  }
  0xbd   : > { %3540 = vmatmul.mubr.f32.gmra.mxu0 %v729_v22 }
  0xbe   : > { %3596 = vmatmul.mubr.f32.gmra.mxu1 %v729_v22  ;;  %3542 = vmatprep.mubr.f32.mxu0 %v730_v23 }
  0xbf   : > { %3598 = vmatprep.mubr.f32.mxu1 %v730_v23 }
  0xc0   : > { %1265 = vperm.xlu0 %4168, %v1130_v24   ;;  %1268 = vperm.xlu1 %4169, %v1131_v25  }
  0xc1   : > { %3543 = vmatmul.mubr.f32.gmra.mxu0 %v731_v26 }
  0xc2   : > { %3599 = vmatmul.mubr.f32.gmra.mxu1 %v731_v26  ;;  %3545 = vmatprep.mubr.f32.mxu0 %v732_v27 }
  0xc3   : > { %3601 = vmatprep.mubr.f32.mxu1 %v732_v27 }
  0xc4   : > { %1271 = vperm.xlu0 %4168, %v1132_v28   ;;  %1274 = vperm.xlu1 %4169, %v1133_v29  }
  0xc5   : > { %3546 = vmatmul.mubr.f32.gmra.mxu0 %v733_v30 }
  0xc6   : > { %3602 = vmatmul.mubr.f32.gmra.mxu1 %v733_v30 }
  0xc8   : > { %1277 = vperm.xlu0 %4168, %v1134_v31   ;;  %1280 = vperm.xlu1 %4169, %v1135_v32  }
  0xcc   : > { %1139 = vperm.xlu0 %4168, %v1104_v33   ;;  %1142 = vperm.xlu1 %4169, %v1105_v34  }
  0xd0   : > { %1145 = vperm.xlu0 %4168, %v1106_v35   ;;  %1148 = vperm.xlu1 %4169, %v1107_v36  }
  0xd4   : > { %1151 = vperm.xlu0 %4168, %v1108_v37   ;;  %1154 = vperm.xlu1 %4169, %v1109_v38  }
  0xd8   : > { %1157 = vperm.xlu0 %4168, %v1110_v39   ;;  %1160 = vperm.xlu1 %4169, %v1111_v40  }
  0xdc   : > { %1163 = vperm.xlu0 %4168, %v1112_v41   ;;  %1166 = vperm.xlu1 %4169, %v1113_v42  }
  0xe0   : > { %1169 = vperm.xlu0 %4168, %v1114_v43   ;;  %1172 = vperm.xlu1 %4169, %v1115_v44  }
  0xe4   : > { %1175 = vperm.xlu0 %4168, %v1116_v45   ;;  %1178 = vperm.xlu1 %4169, %v1117_v46  }
  0xe8   : > { %1181 = vperm.xlu0 %4168, %v1118_v47   ;;  %1184 = vperm.xlu1 %4169, %v1119_v48  }
 0x127   : > { %v1236_v51 = vpop.permute.xlu0 %1235  ;;  %v4893_v54 = vpop.permute.xlu1 %1241 }
 0x128   : > { %vm1282_vm0 = vcmp.eq.s32.totalorder %v1236_v51, %v4889_v50  ;;  %vm1284_vm1 = vcmp.eq.s32.totalorder %v4893_v54, %v4889_v50  ;;  %v1682_v54 = vld [vmem:[#allocation10 + $0x60] sm:$0xff] }
 0x129   : > { %v3113_v53 = vsel %vm1282_vm0, 1.0, %v4458_v52  ;;  %3636 = vmatprep.mubr.msk.f32.mxu0 %vm1282_vm0, %v4459_v55  ;;  %v3115_v58 = vsel %vm1284_vm1, 1.0, %v4458_v52 }
 0x12a   : > { %2102 = vxpose.xlu0.b32.start [1/16] %v3113_v53, 128 }
 0x12b   : > { %v4896_v56 = vpop.permute.xlu0 %1238  ;;  %v4910_v59 = vpop.permute.xlu1 %1244 }
 0x12c   : > { %vm1283_vm2 = vcmp.eq.s32.totalorder %v4896_v56, %v4889_v50  ;;  %vm1285_vm3 = vcmp.eq.s32.totalorder %v4910_v59, %v4889_v50 }
 0x12d   : > { %v3114_v57 = vsel %vm1283_vm2, 1.0, %v4458_v52  ;;  %v3116_v61 = vsel %vm1285_vm3, 1.0, %v4458_v52 }
 0x12e   : > { %2103 = vxpose.xlu0.b32.cont [2/16] %v3114_v57, 128 }
 0x12f   : > { %v4912_v60 = vpop.permute.xlu0 %1247  ;;  %v4928_v0 = vpop.permute.xlu1 %1250 }
 0x130   : > { %vm1286_vm4 = vcmp.eq.s32.totalorder %v4912_v60, %v4889_v50  ;;  %vm1287_vm5 = vcmp.eq.s32.totalorder %v4928_v0, %v4889_v50  ;;  %v1679_v60 = vld [vmem:[#allocation10 + $0x48] sm:$0xff]  ;;  %v1678_v0 = vld [vmem:[#allocation10 + $0x40] sm:$0xff] }
 0x131   : > { %v3117_v63 = vsel %vm1286_vm4, 1.0, %v4458_v52  ;;  %v3118_v2 = vsel %vm1287_vm5, 1.0, %v4458_v52 }
 0x132   : > { %2104 = vxpose.xlu0.b32.cont [3/16] %v3115_v58, 128 }
 0x133   : > { %v4920_v62 = vpop.permute.xlu0 %1253  ;;  %v4946_v5 = vpop.permute.xlu1 %1256 }
 0x134   : > { %vm1288_vm6 = vcmp.eq.s32.totalorder %v4920_v62, %v4889_v50  ;;  %vm1289_vm7 = vcmp.eq.s32.totalorder %v4946_v5, %v4889_v50  ;;  %v1676_v5 = vld [vmem:[#allocation10 + $0x30] sm:$0xff] }
 0x135   : > { %v3119_v4 = vsel %vm1288_vm6, 1.0, %v4458_v52  ;;  %v3120_v7 = vsel %vm1289_vm7, 1.0, %v4458_v52 }
 0x136   : > { %2105 = vxpose.xlu0.b32.cont [4/16] %v3116_v61, 128 }
 0x137   : > { %v4930_v1 = vpop.permute.xlu0 %1259  ;;  %v4964_v10 = vpop.permute.xlu1 %1262 }
 0x138   : > { %vm1290_vm8 = vcmp.eq.s32.totalorder %v4930_v1, %v4889_v50  ;;  %vm1291_vm9 = vcmp.eq.s32.totalorder %v4964_v10, %v4889_v50  ;;  %v1675_v1 = vld [vmem:[#allocation10 + $0x28] sm:$0xff]  ;;  %v1674_v10 = vld [vmem:[#allocation10 + $0x20] sm:$0xff] }
 0x139   : > { %v3121_v9 = vsel %vm1290_vm8, 1.0, %v4458_v52  ;;  %v3122_v12 = vsel %vm1291_vm9, 1.0, %v4458_v52 }
 0x13a   : > { %2106 = vxpose.xlu0.b32.cont [5/16] %v3117_v63, 128 }
 0x13b   : > { %v4938_v3 = vpop.permute.xlu0 %1265  ;;  %v4980_v14 = vpop.permute.xlu1 %1268 }
 0x13c   : > { %vm1292_vm11 = vcmp.eq.s32.totalorder %v4938_v3, %v4889_v50  ;;  %vm1293_vm12 = vcmp.eq.s32.totalorder %v4980_v14, %v4889_v50  ;;  %v1673_v3 = vld [vmem:[#allocation10 + $0x18] sm:$0xff]  ;;  %v1672_v14 = vld [vmem:[#allocation10 + $0x10] sm:$0xff] }
 0x13d   : > { %v3123_v13 = vsel %vm1292_vm11, 1.0, %v4458_v52  ;;  %v3124_v15 = vsel %vm1293_vm12, 1.0, %v4458_v52 }
 0x13e   : > { %2107 = vxpose.xlu0.b32.cont [6/16] %v3118_v2, 128 }
 0x13f   : > { %v4948_v6 = vpop.permute.xlu0 %1271  ;;  %v4994_v17 = vpop.permute.xlu1 %1274 }
 0x140   : > { %vm1294_vm13 = vcmp.eq.s32.totalorder %v4948_v6, %v4889_v50  ;;  %vm1295_vm14 = vcmp.eq.s32.totalorder %v4994_v17, %v4889_v50  ;;  %v1671_v6 = vld [vmem:[#allocation10 + $0x8] sm:$0xff]  ;;  %v5159_v17 = vld [vmem:[#allocation18 + $0x10] sm:$0xff] }
 0x141   : > { %v3125_v16 = vsel %vm1294_vm13, 1.0, %v4458_v52  ;;  %v3126_v18 = vsel %vm1295_vm14, 1.0, %v4458_v52 }
 0x142   : > { %2108 = vxpose.xlu0.b32.cont [7/16] %v3119_v4, 128 }
 0x143   : > { %v4956_v8 = vpop.permute.xlu0 %1277  ;;  %v5008_v20 = vpop.permute.xlu1 %1280 }
 0x144   : > { %vm5492_vm15 = vcmp.eq.s32.totalorder %v4956_v8, %v4889_v50  ;;  %vm5491_vm0 = vcmp.eq.s32.totalorder %v5008_v20, %v4889_v50 }
 0x145   : > { %v3127_v19 = vsel %vm5492_vm15, 1.0, %v4458_v52  ;;  %v3128_v21 = vsel %vm5491_vm0, 1.0, %v4458_v52 }
 0x146   : > { %2109 = vxpose.xlu0.b32.cont [8/16] %v3120_v7, 128 }
 0x147   : > { %v1140_v11 = vpop.permute.xlu0 %1139  ;;  %v1143_v58 = vpop.permute.xlu1 %1142 }
 0x148   : > { %vm1186_vm10 = vcmp.eq.s32.totalorder %v1140_v11, %v4889_v50 }
 0x149   : > { %3692 = vmatprep.mubr.msk.f32.mxu1 %vm1186_vm10, %v4459_v55  ;;  %vm1187_vm10 = vcmp.eq.s32.totalorder %v1143_v58, %v4889_v50 }
 0x14a   : > { %2110 = vxpose.xlu0.b32.cont [9/16] %v3121_v9, 128  ;;  %v1685_v9 = vld [vmem:[#allocation10 + $0x78] sm:$0xff] }
 0x14b   : > { %v1146_v61 = vpop.permute.xlu0 %1145  ;;  %v1149_v63 = vpop.permute.xlu1 %1148 }
 0x14c   : > { %vm1188_vm0 = vcmp.eq.s32.totalorder %v1146_v61, %v4889_v50  ;;  %vm1189_vm15 = vcmp.eq.s32.totalorder %v1149_v63, %v4889_v50 }
 0x14e   : > { %2111 = vxpose.xlu0.b32.cont [10/16] %v3122_v12, 128  ;;  %v1684_v12 = vld [vmem:[#allocation10 + $0x70] sm:$0xff] }
 0x14f   : > { %v1152_v2 = vpop.permute.xlu0 %1151  ;;  %v1155_v4 = vpop.permute.xlu1 %1154 }
 0x152   : > { %2112 = vxpose.xlu0.b32.cont [11/16] %v3123_v13, 128  ;;  %v1683_v13 = vld [vmem:[#allocation10 + $0x68] sm:$0xff] }
 0x153   : > { %v1158_v7 = vpop.permute.xlu0 %1157  ;;  %v1161_v11 = vpop.permute.xlu1 %1160 }
 0x156   : > { %2113 = vxpose.xlu0.b32.cont [12/16] %v3124_v15, 128 }
 0x157   : > { %v1164_v15 = vpop.permute.xlu0 %1163  ;;  %v1167_v56 = vpop.permute.xlu1 %1166 }
 0x15a   : > { %2114 = vxpose.xlu0.b32.cont [13/16] %v3125_v16, 128  ;;  %v1681_v16 = vld [vmem:[#allocation10 + $0x58] sm:$0xff] }
 0x15b   : > { %v1170_v59 = vpop.permute.xlu0 %1169 }
 0x15e   : > { %2115 = vxpose.xlu0.b32.cont [14/16] %v3126_v18, 128  ;;  %v1680_v18 = vld [vmem:[#allocation10 + $0x50] sm:$0xff] }
 0x15f   : > { %v1176_v62 = vpop.permute.xlu0 %1175 }
 0x162   : > { %2116 = vxpose.xlu0.b32.cont [15/16] %v3127_v19, 128  ;;  %v1173_v19 = vpop.permute.xlu1 %1172 }
 0x166   : > { %2117 = vxpose.xlu0.b32.end [16/16] %v3128_v21, 128  ;;  %v1677_v21 = vld [vmem:[#allocation10 + $0x38] sm:$0xff] }
 0x169   : > { %v5016_v22 = vpop.f32.mrf.mxu0 }
 0x16a   : > { %v5018_v23 = vpop.f32.mrf.mxu1 }
 0x16b   : > { %v5020_v24 = vpop.f32.mrf.mxu0 }
 0x16c   : > { %v5022_v25 = vpop.f32.mrf.mxu1 }
 0x16d   : > { %v5024_v26 = vpop.f32.mrf.mxu0 }
 0x16e   : > { %v5026_v27 = vpop.f32.mrf.mxu1 }
 0x16f   : > { %v5028_v28 = vpop.f32.mrf.mxu0 }
 0x170   : > { %v5030_v29 = vpop.f32.mrf.mxu1 }
 0x171   : > { %v5032_v30 = vpop.f32.mrf.mxu0 }
 0x172   : > { %v5034_v31 = vpop.f32.mrf.mxu1 }
 0x173   : > { %v5036_v32 = vpop.f32.mrf.mxu0 }
 0x174   : > { %v5038_v33 = vpop.f32.mrf.mxu1 }
 0x175   : > { %v3535_v34 = vpop.f32.mrf.mxu0 }
 0x176   : > { %v3591_v35 = vpop.f32.mrf.mxu1 }
 0x177   : > { %v846_v36 = vpop.f32.mrf.mxu0 }
 0x178   : > { %v1023_v37 = vpop.f32.mrf.mxu1 }
 0x179   : > { %v3538_v38 = vpop.f32.mrf.mxu0 }
 0x17a   : > { %v3594_v39 = vpop.f32.mrf.mxu1 }
 0x17b   : > { %v856_v40 = vpop.f32.mrf.mxu0 }
 0x17c   : > { %v1033_v41 = vpop.f32.mrf.mxu1 }
 0x17d   : > { %v3541_v42 = vpop.f32.mrf.mxu0 }
 0x17e   : > { %v3597_v43 = vpop.f32.mrf.mxu1 }
 0x17f   : > { %v866_v44 = vpop.f32.mrf.mxu0 }
 0x180   : > { %v1043_v45 = vpop.f32.mrf.mxu1 }
 0x181   : > { %v3544_v46 = vpop.f32.mrf.mxu0 }
 0x182   : > { %v3600_v47 = vpop.f32.mrf.mxu1 }
 0x183   : > { %v876_v48 = vpop.f32.mrf.mxu0 }
 0x184   : > { %v1053_v49 = vpop.f32.mrf.mxu1 }
 0x185   : > { %v3547_v51 = vpop.f32.mrf.mxu0 }
 0x186   : > { %v3603_v52 = vpop.f32.mrf.mxu1  ;;  %3660 = vmatprep.subr.mxu1 %v3547_v51 }
 0x187   : > { %3604 = vmatprep.subr.mxu0 %v3603_v52  ;;  %v886_v53 = vpop.f32.mrf.mxu0  ;;  %3661 = vmatpush3.msra.mxu1 %v3547_v51  ;;  %v1888_v51 = vld [vmem:[#allocation11 + $0x10] sm:$0xff] }
 0x188   : > { %v1063_v57 = vpop.f32.mrf.mxu1  ;;  %3605 = vmatpush3.msra.mxu0 %v3603_v52  ;;  %3662 = vmatprep.subr.mxu1 %v886_v53  ;;  %v1887_v52 = vld [vmem:[#allocation11 + $0x8] sm:$0xff] }
 0x189   : > { %3606 = vmatprep.subr.mxu0 %v1063_v57  ;;  %3663 = vmatpush3.msra.mxu1 %v886_v53  ;;  %v1886_v53 = vld [vmem:[#allocation11] sm:$0xff] }
 0x18a   : > { %3607 = vmatpush3.msra.mxu0 %v1063_v57  ;;  %3664 = vmatprep.subr.mxu1 %v3544_v46 }
 0x18b   : > { %3608 = vmatprep.subr.mxu0 %v3600_v47  ;;  %3665 = vmatpush3.msra.mxu1 %v3544_v46  ;;  %v1892_v46 = vld [vmem:[#allocation11 + $0x30] sm:$0xff] }
 0x18c   : > { %3609 = vmatpush3.msra.mxu0 %v3600_v47  ;;  %3666 = vmatprep.subr.mxu1 %v876_v48  ;;  %v1891_v47 = vld [vmem:[#allocation11 + $0x28] sm:$0xff] }
 0x18d   : > { %3610 = vmatprep.subr.mxu0 %v1053_v49  ;;  %3667 = vmatpush3.msra.mxu1 %v876_v48  ;;  %v1890_v48 = vld [vmem:[#allocation11 + $0x20] sm:$0xff] }
 0x18e   : > { %3611 = vmatpush3.msra.mxu0 %v1053_v49  ;;  %3668 = vmatprep.subr.mxu1 %v3541_v42  ;;  %v1889_v49 = vld [vmem:[#allocation11 + $0x18] sm:$0xff] }
 0x18f   : > { %3612 = vmatprep.subr.mxu0 %v3597_v43  ;;  %3669 = vmatpush3.msra.mxu1 %v3541_v42  ;;  %v1896_v42 = vld [vmem:[#allocation11 + $0x50] sm:$0xff] }
 0x190   : > { %3613 = vmatpush3.msra.mxu0 %v3597_v43  ;;  %3670 = vmatprep.subr.mxu1 %v866_v44  ;;  %v1895_v43 = vld [vmem:[#allocation11 + $0x48] sm:$0xff] }
 0x191   : > { %3614 = vmatprep.subr.mxu0 %v1043_v45  ;;  %3671 = vmatpush3.msra.mxu1 %v866_v44  ;;  %v1894_v44 = vld [vmem:[#allocation11 + $0x40] sm:$0xff] }
 0x192   : > { %3615 = vmatpush3.msra.mxu0 %v1043_v45  ;;  %3672 = vmatprep.subr.mxu1 %v3538_v38  ;;  %v1893_v45 = vld [vmem:[#allocation11 + $0x38] sm:$0xff] }
 0x193   : > { %3616 = vmatprep.subr.mxu0 %v3594_v39  ;;  %3673 = vmatpush3.msra.mxu1 %v3538_v38  ;;  %v1900_v38 = vld [vmem:[#allocation11 + $0x70] sm:$0xff] }
 0x194   : > { %3617 = vmatpush3.msra.mxu0 %v3594_v39  ;;  %3674 = vmatprep.subr.mxu1 %v856_v40  ;;  %v1899_v39 = vld [vmem:[#allocation11 + $0x68] sm:$0xff] }
 0x195   : > { %3618 = vmatprep.subr.mxu0 %v1033_v41  ;;  %3675 = vmatpush3.msra.mxu1 %v856_v40  ;;  %v1898_v40 = vld [vmem:[#allocation11 + $0x60] sm:$0xff] }
 0x196   : > { %3619 = vmatpush3.msra.mxu0 %v1033_v41  ;;  %3676 = vmatprep.subr.mxu1 %v3535_v34  ;;  %v1897_v41 = vld [vmem:[#allocation11 + $0x58] sm:$0xff] }
 0x197   : > { %3620 = vmatprep.subr.mxu0 %v3591_v35  ;;  %3677 = vmatpush3.msra.mxu1 %v3535_v34  ;;  %v5193_v34 = vld [vmem:[#allocation18 + $0x68] sm:$0xff] }
 0x198   : > { %3621 = vmatpush3.msra.mxu0 %v3591_v35  ;;  %3678 = vmatprep.subr.mxu1 %v846_v36  ;;  %v5195_v35 = vld [vmem:[#allocation18 + $0x70] sm:$0xff] }
 0x199   : > { %3622 = vmatprep.subr.mxu0 %v1023_v37  ;;  %3679 = vmatpush3.msra.mxu1 %v846_v36  ;;  %v5199_v36 = vld [vmem:[#allocation18 + $0x78] sm:$0xff] }
 0x19a   : > { %3623 = vmatpush3.msra.mxu0 %v1023_v37  ;;  %3680 = vmatprep.subr.mxu1 %v5032_v30  ;;  %v1901_v37 = vld [vmem:[#allocation11 + $0x78] sm:$0xff] }
 0x19b   : > { %3624 = vmatprep.subr.mxu0 %v5034_v31  ;;  %3681 = vmatpush3.msra.mxu1 %v5032_v30  ;;  %v5181_v30 = vld [vmem:[#allocation18 + $0x48] sm:$0xff] }
 0x19c   : > { %3625 = vmatpush3.msra.mxu0 %v5034_v31  ;;  %3682 = vmatprep.subr.mxu1 %v5036_v32  ;;  %v5183_v31 = vld [vmem:[#allocation18 + $0x50] sm:$0xff] }
 0x19d   : > { %3626 = vmatprep.subr.mxu0 %v5038_v33  ;;  %3683 = vmatpush3.msra.mxu1 %v5036_v32  ;;  %v5187_v32 = vld [vmem:[#allocation18 + $0x58] sm:$0xff] }
 0x19e   : > { %3627 = vmatpush3.msra.mxu0 %v5038_v33  ;;  %3684 = vmatprep.subr.mxu1 %v5024_v26  ;;  %v5189_v33 = vld [vmem:[#allocation18 + $0x60] sm:$0xff] }
 0x19f   : > { %3628 = vmatprep.subr.mxu0 %v5026_v27  ;;  %3685 = vmatpush3.msra.mxu1 %v5024_v26  ;;  %v1670_v26 = vld [vmem:[#allocation10] sm:$0xff] }
 0x1a0   : > { %3629 = vmatpush3.msra.mxu0 %v5026_v27  ;;  %3686 = vmatprep.subr.mxu1 %v5028_v28  ;;  %v5163_v27 = vld [vmem:[#allocation18 + $0x18] sm:$0xff] }
 0x1a1   : > { %3630 = vmatprep.subr.mxu0 %v5030_v29  ;;  %3687 = vmatpush3.msra.mxu1 %v5028_v28  ;;  %v5165_v28 = vld [vmem:[#allocation18 + $0x20] sm:$0xff] }
 0x1a2   : > { %3631 = vmatpush3.msra.mxu0 %v5030_v29  ;;  %3688 = vmatprep.subr.mxu1 %v5016_v22  ;;  %v5177_v29 = vld [vmem:[#allocation18 + $0x40] sm:$0xff] }
 0x1a3   : > { %3632 = vmatprep.subr.mxu0 %v5018_v23  ;;  %3689 = vmatpush3.msra.mxu1 %v5016_v22  ;;  %v1179_v22 = vpop.permute.xlu1 %1178 }
 0x1a4   : > { %3633 = vmatpush3.msra.mxu0 %v5018_v23  ;;  %3690 = vmatprep.subr.mxu1 %v5020_v24  ;;  %v1182_v23 = vpop.permute.xlu0 %1181 }
 0x1a5   : > { %3634 = vmatprep.subr.mxu0 %v5022_v25  ;;  %3691 = vmatpush3.msra.mxu1 %v5020_v24 }
 0x1a6   : > { %3635 = vmatpush3.msra.mxu0 %v5022_v25  ;;  %3693 = vmatmul.mubr.msk.f32.vlgmr.msra.gmra.mxu1 %vm1187_vm10, %v4459_v55  ;;  %v5150_v25 = vld [vmem:[#allocation18] sm:$0xff] }
 0x1a7   : > { %3637 = vmatmul.mubr.msk.f32.vlgmr.msra.gmra.mxu0 %vm1283_vm2, %v4459_v55  ;;  %3716 = vmatprep.subr.mxu0 %v1685_v9  ;;  %vm1190_vm2 = vcmp.eq.s32.totalorder %v1152_v2, %v4889_v50  ;;  %v1185_v24 = vpop.permute.xlu1 %1184 }
 0x1a8   : > { %3639 = vmatprep.mubr.msk.f32.mxu0 %vm1284_vm1, %v4459_v55  ;;  %3695 = vmatprep.mubr.msk.f32.mxu1 %vm1188_vm0, %v4459_v55  ;;  %vm1191_vm1 = vcmp.eq.s32.totalorder %v1155_v4, %v4889_v50 }
 0x1a9   : > { %3717 = vmatpush3.msra.mxu0 %v1685_v9  ;;  %3772 = vmatprep.subr.mxu1 %v1901_v37 }
 0x1aa   : > { %3718 = vmatprep.subr.mxu0 %v1684_v12  ;;  %3696 = vmatmul.mubr.msk.f32.gmra.mxu1 %vm1189_vm15, %v4459_v55  ;;  %vm1192_vm15 = vcmp.eq.s32.totalorder %v1158_v7, %v4889_v50 }
 0x1ab   : > { %3719 = vmatpush3.msra.mxu0 %v1684_v12  ;;  %3698 = vmatprep.mubr.msk.f32.mxu1 %vm1190_vm2, %v4459_v55 }
 0x1ac   : > { %3640 = vmatmul.mubr.msk.f32.gmra.mxu0 %vm1285_vm3, %v4459_v55  ;;  %3720 = vmatprep.subr.mxu0 %v1683_v13  ;;  %vm1193_vm3 = vcmp.eq.s32.totalorder %v1161_v11, %v4889_v50 }
 0x1ad   : > { %3642 = vmatprep.mubr.msk.f32.mxu0 %vm1286_vm4, %v4459_v55  ;;  %3721 = vmatpush3.msra.mxu0 %v1683_v13  ;;  %vm1194_vm4 = vcmp.eq.s32.totalorder %v1164_v15, %v4889_v50 }
 0x1ae   : > { %3722 = vmatprep.subr.mxu0 %v1682_v54  ;;  %3699 = vmatmul.mubr.msk.f32.gmra.mxu1 %vm1191_vm1, %v4459_v55 }
 0x1af   : > { %3723 = vmatpush3.msra.mxu0 %v1682_v54  ;;  %3701 = vmatprep.mubr.msk.f32.mxu1 %vm1192_vm15, %v4459_v55 }
 0x1b0   : > { %3643 = vmatmul.mubr.msk.f32.gmra.mxu0 %vm1287_vm5, %v4459_v55  ;;  %3724 = vmatprep.subr.mxu0 %v1681_v16  ;;  %vm1195_vm5 = vcmp.eq.s32.totalorder %v1167_v56, %v4889_v50 }
 0x1b1   : > { %3645 = vmatprep.mubr.msk.f32.mxu0 %vm1288_vm6, %v4459_v55  ;;  %3725 = vmatpush3.msra.mxu0 %v1681_v16  ;;  %vm1196_vm6 = vcmp.eq.s32.totalorder %v1170_v59, %v4889_v50 }
 0x1b2   : > { %3726 = vmatprep.subr.mxu0 %v1680_v18  ;;  %3702 = vmatmul.mubr.msk.f32.gmra.mxu1 %vm1193_vm3, %v4459_v55 }
 0x1b3   : > { %3727 = vmatpush3.msra.mxu0 %v1680_v18  ;;  %3704 = vmatprep.mubr.msk.f32.mxu1 %vm1194_vm4, %v4459_v55 }
 0x1b4   : > { %3646 = vmatmul.mubr.msk.f32.gmra.mxu0 %vm1289_vm7, %v4459_v55  ;;  %3728 = vmatprep.subr.mxu0 %v1679_v60  ;;  %vm1197_vm7 = vcmp.eq.s32.totalorder %v1173_v19, %v4889_v50 }
 0x1b5   : > { %3648 = vmatprep.mubr.msk.f32.mxu0 %vm1290_vm8, %v4459_v55  ;;  %3729 = vmatpush3.msra.mxu0 %v1679_v60  ;;  %vm1198_vm8 = vcmp.eq.s32.totalorder %v1176_v62, %v4889_v50 }
 0x1b6   : > { %3730 = vmatprep.subr.mxu0 %v1678_v0  ;;  %3705 = vmatmul.mubr.msk.f32.gmra.mxu1 %vm1195_vm5, %v4459_v55 }
 0x1b7   : > { %3731 = vmatpush3.msra.mxu0 %v1678_v0  ;;  %3707 = vmatprep.mubr.msk.f32.mxu1 %vm1196_vm6, %v4459_v55 }
 0x1b8   : > { %3649 = vmatmul.mubr.msk.f32.gmra.mxu0 %vm1291_vm9, %v4459_v55  ;;  %3732 = vmatprep.subr.mxu0 %v1677_v21  ;;  %vm1199_vm9 = vcmp.eq.s32.totalorder %v1179_v22, %v4889_v50 }
 0x1b9   : > { %3651 = vmatprep.mubr.msk.f32.mxu0 %vm1292_vm11, %v4459_v55  ;;  %3733 = vmatpush3.msra.mxu0 %v1677_v21  ;;  %vm1200_vm11 = vcmp.eq.s32.totalorder %v1182_v23, %v4889_v50 }
 0x1ba   : > { %3734 = vmatprep.subr.mxu0 %v1676_v5  ;;  %3708 = vmatmul.mubr.msk.f32.gmra.mxu1 %vm1197_vm7, %v4459_v55 }
 0x1bb   : > { %3735 = vmatpush3.msra.mxu0 %v1676_v5  ;;  %3710 = vmatprep.mubr.msk.f32.mxu1 %vm1198_vm8, %v4459_v55 }
 0x1bc   : > { %3652 = vmatmul.mubr.msk.f32.gmra.mxu0 %vm1293_vm12, %v4459_v55  ;;  %3736 = vmatprep.subr.mxu0 %v1675_v1  ;;  %vm1201_vm12 = vcmp.eq.s32.totalorder %v1185_v24, %v4889_v50 }
 0x1bd   : > { %3654 = vmatprep.mubr.msk.f32.mxu0 %vm1294_vm13, %v4459_v55  ;;  %3737 = vmatpush3.msra.mxu0 %v1675_v1  ;;  %vm5506_vm13 = vcmp.eq.s32.totalorder %v4956_v8, %v4889_v50  ;;  %v5157_v8 = vld [vmem:[#allocation18 + $0x8] sm:$0xff] }
 0x1be   : > { %3738 = vmatprep.subr.mxu0 %v1674_v10  ;;  %3711 = vmatmul.mubr.msk.f32.gmra.mxu1 %vm1199_vm9, %v4459_v55 }
 0x1bf   : > { %3739 = vmatpush3.msra.mxu0 %v1674_v10  ;;  %3713 = vmatprep.mubr.msk.f32.mxu1 %vm1200_vm11, %v4459_v55 }
 0x1c0   : > { %3655 = vmatmul.mubr.msk.f32.gmra.mxu0 %vm1295_vm14, %v4459_v55  ;;  %3740 = vmatprep.subr.mxu0 %v1673_v3  ;;  %vm5507_vm14 = vcmp.eq.s32.totalorder %v5008_v20, %v4889_v50  ;;  %v5169_v50 = vld [vmem:[#allocation18 + $0x28] sm:$0xff]  ;;  %v5175_v20 = vld [vmem:[#allocation18 + $0x38] sm:$0xff] }
 0x1c1   : > { %3657 = vmatprep.mubr.msk.f32.mxu0 %vm5506_vm13, %v4459_v55  ;;  %3741 = vmatpush3.msra.mxu0 %v1673_v3 }
 0x1c2   : > { %3742 = vmatprep.subr.mxu0 %v1672_v14  ;;  %3714 = vmatmul.mubr.msk.f32.gmra.mxu1 %vm1201_vm12, %v4459_v55 }
 0x1c3   : > { %3743 = vmatpush3.msra.mxu0 %v1672_v14  ;;  %3773 = vmatpush3.msra.mxu1 %v1901_v37  ;;  %v5217_v14 = vld [vmem:[%s5479_s7] ss:$0 sm:$0xff] }
 0x1c4   : > { %3658 = vmatmul.mubr.msk.f32.gmra.mxu0 %vm5507_vm14, %v4459_v55  ;;  %3744 = vmatprep.subr.mxu0 %v1671_v6  ;;  %v5171_v55 = vld [vmem:[#allocation18 + $0x30] sm:$0xff] }
 0x1c5   : > { %3745 = vmatpush3.msra.mxu0 %v1671_v6  ;;  %3748 = vmatprep.mubr.f32.mxu0 %v5150_v25 }
 0x1c6   : > { %3746 = vmatprep.subr.mxu0 %v1670_v26  ;;  %3774 = vmatprep.subr.mxu1 %v1900_v38 }
 0x1c7   : > { %3747 = vmatpush3.msra.mxu0 %v1670_v26  ;;  %3775 = vmatpush3.msra.mxu1 %v1900_v38 }
 0x1c8   : > { %3749 = vmatmul.mubr.f32.vlgmr.msra.gmra.mxu0 %v5157_v8  ;;  %3776 = vmatprep.subr.mxu1 %v1899_v39 }
 0x1c9   : > { %3751 = vmatprep.mubr.f32.mxu0 %v5159_v17  ;;  %3777 = vmatpush3.msra.mxu1 %v1899_v39 }
 0x1ca   : > { %3778 = vmatprep.subr.mxu1 %v1898_v40 }
 0x1cb   : > { %3779 = vmatpush3.msra.mxu1 %v1898_v40 }
 0x1cc   : > { %3752 = vmatmul.mubr.f32.gmra.mxu0 %v5163_v27  ;;  %3780 = vmatprep.subr.mxu1 %v1897_v41 }
 0x1cd   : > { %3754 = vmatprep.mubr.f32.mxu0 %v5165_v28  ;;  %3781 = vmatpush3.msra.mxu1 %v1897_v41 }
 0x1ce   : > { %3782 = vmatprep.subr.mxu1 %v1896_v42 }
 0x1cf   : > { %3783 = vmatpush3.msra.mxu1 %v1896_v42 }
 0x1d0   : > { %3755 = vmatmul.mubr.f32.gmra.mxu0 %v5169_v50  ;;  %3784 = vmatprep.subr.mxu1 %v1895_v43 }
 0x1d1   : > { %3757 = vmatprep.mubr.f32.mxu0 %v5171_v55  ;;  %3785 = vmatpush3.msra.mxu1 %v1895_v43 }
 0x1d2   : > { %3786 = vmatprep.subr.mxu1 %v1894_v44 }
 0x1d3   : > { %3787 = vmatpush3.msra.mxu1 %v1894_v44 }
 0x1d4   : > { %3758 = vmatmul.mubr.f32.gmra.mxu0 %v5175_v20  ;;  %3788 = vmatprep.subr.mxu1 %v1893_v45 }
 0x1d5   : > { %3760 = vmatprep.mubr.f32.mxu0 %v5177_v29  ;;  %3789 = vmatpush3.msra.mxu1 %v1893_v45 }
 0x1d6   : > { %3790 = vmatprep.subr.mxu1 %v1892_v46 }
 0x1d7   : > { %3791 = vmatpush3.msra.mxu1 %v1892_v46 }
 0x1d8   : > { %3761 = vmatmul.mubr.f32.gmra.mxu0 %v5181_v30  ;;  %3792 = vmatprep.subr.mxu1 %v1891_v47 }
 0x1d9   : > { %3763 = vmatprep.mubr.f32.mxu0 %v5183_v31  ;;  %3793 = vmatpush3.msra.mxu1 %v1891_v47 }
 0x1da   : > { %3794 = vmatprep.subr.mxu1 %v1890_v48 }
 0x1db   : > { %3795 = vmatpush3.msra.mxu1 %v1890_v48 }
 0x1dc   : > { %3764 = vmatmul.mubr.f32.gmra.mxu0 %v5187_v32  ;;  %3796 = vmatprep.subr.mxu1 %v1889_v49 }
 0x1dd   : > { %3766 = vmatprep.mubr.f32.mxu0 %v5189_v33  ;;  %3797 = vmatpush3.msra.mxu1 %v1889_v49 }
 0x1de   : > { %3798 = vmatprep.subr.mxu1 %v1888_v51 }
 0x1df   : > { %3799 = vmatpush3.msra.mxu1 %v1888_v51 }
 0x1e0   : > { %3767 = vmatmul.mubr.f32.gmra.mxu0 %v5193_v34  ;;  %3800 = vmatprep.subr.mxu1 %v1887_v52 }
 0x1e1   : > { %3769 = vmatprep.mubr.f32.mxu0 %v5195_v35  ;;  %3801 = vmatpush3.msra.mxu1 %v1887_v52 }
 0x1e2   : > { %3802 = vmatprep.subr.mxu1 %v1886_v53 }
 0x1e3   : > { %3803 = vmatpush3.msra.mxu1 %v1886_v53 }
 0x1e4   : > { %3770 = vmatmul.mubr.f32.gmra.mxu0 %v5199_v36 }
 0x266   : > { %v3694_v58 = vpop.f32.mrf.mxu1 }
 0x267   : > { %v3638_v57 = vpop.f32.mrf.mxu0 }
 0x268   : > { %v1591_v63 = vpop.f32.mrf.mxu1  ;;  %v1597_v23 = vadd.f32 %v3694_v58, %v3638_v57 }
 0x269   : > { %v1446_v61 = vpop.f32.mrf.mxu0 }
 0x26a   : > { %v3697_v7 = vpop.f32.mrf.mxu1  ;;  %v1592_v3 = vadd.f32 %v1591_v63, %v1446_v61 }
 0x26c   : > { %v3641_v2 = vpop.f32.mrf.mxu0  ;;  %v1601_v11 = vpop.f32.mrf.mxu1 }
 0x26d   : > { %v1607_v37 = vadd.f32 %v3697_v7, %v3641_v2 }
 0x26e   : > { %v1456_v4 = vpop.f32.mrf.mxu0  ;;  %v3700_v15 = vpop.f32.mrf.mxu1 }
 0x26f   : > { %v1602_v41 = vadd.f32 %v1601_v11, %v1456_v4 }
 0x270   : > { %v3644_v9 = vpop.f32.mrf.mxu0  ;;  %v1611_v16 = vpop.f32.mrf.mxu1 }
 0x271   : > { %v1617_v46 = vadd.f32 %v3700_v15, %v3644_v9 }
 0x272   : > { %v1466_v12 = vpop.f32.mrf.mxu0  ;;  %v3703_v60 = vpop.f32.mrf.mxu1 }
 0x273   : > { %v1612_v53 = vadd.f32 %v1611_v16, %v1466_v12 }
 0x274   : > { %v3647_v13 = vpop.f32.mrf.mxu0  ;;  %v1621_v62 = vpop.f32.mrf.mxu1 }
 0x275   : > { %v1627_v2 = vadd.f32 %v3703_v60, %v3647_v13 }
 0x276   : > { %v1476_v54 = vpop.f32.mrf.mxu0  ;;  %v3706_v22 = vpop.f32.mrf.mxu1 }
 0x278   : > { %v3650_v56 = vpop.f32.mrf.mxu0  ;;  %v1631_v6 = vpop.f32.mrf.mxu1 }
 0x27a   : > { %v1486_v59 = vpop.f32.mrf.mxu0  ;;  %v3709_v44 = vpop.f32.mrf.mxu1 }
 0x27c   : > { %v5202_v18 = vpop.f32.mrf.mxu0  ;;  %v1641_v61 = vpop.f32.mrf.mxu1 }
 0x27e   : > { %v5204_v19 = vpop.f32.mrf.mxu0  ;;  %v3712_v12 = vpop.f32.mrf.mxu1 }
 0x280   : > { %v5206_v0 = vpop.f32.mrf.mxu0 }
 0x282   : > { %v5208_v21 = vpop.f32.mrf.mxu0 }
 0x284   : > { %v5210_v5 = vpop.f32.mrf.mxu0 }
 0x286   : > { %v5212_v1 = vpop.f32.mrf.mxu0 }
 0x288   : > { %v3750_v10 = vpop.f32.mrf.mxu0 }
 0x289   : > { %v1832_v24 = vadd.f32 %v3750_v10, %v1597_v23  ;;  %v1622_v23 = vadd.f32 %v1621_v62, %v1476_v54  ;;  %v1651_v54 = vpop.f32.mrf.mxu1 }
 0x28a   : > { %v1752_v26 = vpop.f32.mrf.mxu0 }
 0x28b   : > { %v1831_v38 = vadd.f32 %v1752_v26, %v1592_v3  ;;  %v1855_v39 = vadd.f32 %v5217_v14, %v1832_v24  ;;  %v1637_v24 = vadd.f32 %v3706_v22, %v3650_v56 }
 0x28c   : > { %v3753_v40 = vpop.f32.mrf.mxu0 }
 0x28d   : > { %v1854_v42 = vadd.f32 %v5217_v14, %v1831_v38  ;;  %v1834_v43 = vadd.f32 %v3753_v40, %v1607_v37  ;;  %v1871_v49 = vmax.f32 %v1855_v39, 0.0  ;;  %v1632_v39 = vadd.f32 %v1631_v6, %v1486_v59  ;;  %v3715_v6 = vpop.f32.mrf.mxu1 }
 0x28e   : > { %v1762_v45 = vpop.f32.mrf.mxu0 }
 0x28f   : > { %v1870_v47 = vmax.f32 %v1854_v42, 0.0  ;;  %v1833_v48 = vadd.f32 %v1762_v45, %v1602_v41  ;;  %v1857_v51 = vadd.f32 %v5217_v14, %v1834_v43  ;;  %v1647_v42 = vadd.f32 %v3709_v44, %v5202_v18 }
 0x290   : > { %v3756_v52 = vpop.f32.mrf.mxu0 }
 0x291   : > { %v1856_v57 = vadd.f32 %v5217_v14, %v1833_v48  ;;  %v1836_v58 = vadd.f32 %v3756_v52, %v1617_v46  ;;  %3804 = vmatprep.mubr.f32.mxu1 %v1870_v47  ;;  %v1873_v11 = vmax.f32 %v1857_v51, 0.0  ;;  %v1642_v47 = vadd.f32 %v1641_v61, %v5204_v19  ;;  %v1661_v61 = vpop.f32.mrf.mxu1 }
 0x292   : > { %v1772_v63 = vpop.f32.mrf.mxu0  ;;  %3805 = vmatmul.mubr.f32.vlgmr.msra.gmra.mxu1 %v1871_v49  ;;  %v1657_v51 = vadd.f32 %v3712_v12, %v5206_v0 }
 0x293   : > { %v1872_v4 = vmax.f32 %v1856_v57, 0.0  ;;  %v1835_v7 = vadd.f32 %v1772_v63, %v1612_v53  ;;  %v1859_v9 = vadd.f32 %v5217_v14, %v1836_v58  ;;  %v1652_v58 = vadd.f32 %v1651_v54, %v5208_v21  ;;  %v2371_v54 = vld [vmem:[#allocation14 + $0x48] sm:$0xff] }
 0x294   : > { %v3759_v15 = vpop.f32.mrf.mxu0 }
 0x295   : > { %v1858_v10 = vadd.f32 %v5217_v14, %v1835_v7  ;;  %v1838_v3 = vadd.f32 %v3759_v15, %v1627_v2  ;;  %3807 = vmatprep.mubr.f32.mxu1 %v1872_v4  ;;  %v1875_v38 = vmax.f32 %v1859_v9, 0.0  ;;  %v1667_v4 = vadd.f32 %v3715_v6, %v5210_v5 }
 0x296   : > { %v1782_v16 = vpop.f32.mrf.mxu0  ;;  %3808 = vmatmul.mubr.f32.gmra.mxu1 %v1873_v11 }
 0x297   : > { %v1874_v26 = vmax.f32 %v1858_v10, 0.0  ;;  %v1837_v37 = vadd.f32 %v1782_v16, %v1622_v23  ;;  %v1861_v13 = vadd.f32 %v5217_v14, %v1838_v3  ;;  %v1662_v23 = vadd.f32 %v1661_v61, %v5212_v1  ;;  %v2118_v1 = vpop.trf.xlu0 }
 0x298   : > { %v3762_v60 = vpop.f32.mrf.mxu0  ;;  %3860 = vmatprep.mubr.f32.mxu0 %v2118_v1 }
 0x299   : > { %v1860_v40 = vadd.f32 %v5217_v14, %v1837_v37  ;;  %v1840_v41 = vadd.f32 %v3762_v60, %v1637_v24  ;;  %3810 = vmatprep.mubr.f32.mxu1 %v1874_v26  ;;  %v1877_v46 = vmax.f32 %v1861_v13, 0.0  ;;  %v2377_v13 = vld [vmem:[#allocation14 + $0x78] sm:$0xff]  ;;  %v2376_v60 = vld [vmem:[#allocation14 + $0x70] sm:$0xff] }
 0x29a   : > { %v1792_v62 = vpop.f32.mrf.mxu0  ;;  %3811 = vmatmul.mubr.f32.gmra.mxu1 %v1875_v38  ;;  %3884 = vmatprep.subr.mxu1 %v2377_v13 }
 0x29b   : > { %v1876_v43 = vmax.f32 %v1860_v40, 0.0  ;;  %v1839_v45 = vadd.f32 %v1792_v62, %v1632_v39  ;;  %v1863_v56 = vadd.f32 %v5217_v14, %v1840_v41  ;;  %3885 = vmatpush3.msra.mxu1 %v2377_v13  ;;  %v2375_v39 = vld [vmem:[#allocation14 + $0x68] sm:$0xff]  ;;  %v2374_v40 = vld [vmem:[#allocation14 + $0x60] sm:$0xff]  ;;  %v2373_v41 = vld [vmem:[#allocation14 + $0x58] sm:$0xff] }
 0x29c   : > { %v3765_v22 = vpop.f32.mrf.mxu0  ;;  %3886 = vmatprep.subr.mxu1 %v2376_v60  ;;  %v2370_v62 = vld [vmem:[#allocation14 + $0x40] sm:$0xff] }
 0x29d   : > { %v1862_v48 = vadd.f32 %v5217_v14, %v1839_v45  ;;  %v1842_v59 = vadd.f32 %v3765_v22, %v1647_v42  ;;  %3813 = vmatprep.mubr.f32.mxu1 %v1876_v43  ;;  %v1879_v18 = vmax.f32 %v1863_v56, 0.0  ;;  %3887 = vmatpush3.msra.mxu1 %v2376_v60  ;;  %v2369_v42 = vld [vmem:[#allocation14 + $0x38] sm:$0xff]  ;;  %v2368_v43 = vld [vmem:[#allocation14 + $0x30] sm:$0xff]  ;;  %v2367_v45 = vld [vmem:[#allocation14 + $0x28] sm:$0xff] }
 0x29e   : > { %v1802_v49 = vpop.f32.mrf.mxu0  ;;  %3814 = vmatmul.mubr.f32.gmra.mxu1 %v1877_v46  ;;  %3888 = vmatprep.subr.mxu1 %v2375_v39  ;;  %v2366_v46 = vld [vmem:[#allocation14 + $0x20] sm:$0xff]  ;;  %v2365_v56 = vld [vmem:[#allocation14 + $0x18] sm:$0xff]  ;;  %v2364_v22 = vld [vmem:[#allocation14 + $0x10] sm:$0xff] }
 0x29f   : > { %v1878_v52 = vmax.f32 %v1862_v48, 0.0  ;;  %v1841_v53 = vadd.f32 %v1802_v49, %v1642_v47  ;;  %v1865_v44 = vadd.f32 %v5217_v14, %v1842_v59  ;;  %3889 = vmatpush3.msra.mxu1 %v2375_v39  ;;  %v5244_v47 = vld [vmem:[%s5481_s9] ss:$0 sm:$0xff] }
 0x2a0   : > { %v3768_v57 = vpop.f32.mrf.mxu0  ;;  %3890 = vmatprep.subr.mxu1 %v2374_v40 }
 0x2a1   : > { %v1864_v63 = vadd.f32 %v5217_v14, %v1841_v53  ;;  %v1844_v19 = vadd.f32 %v3768_v57, %v1657_v51  ;;  %3816 = vmatprep.mubr.f32.mxu1 %v1878_v52  ;;  %v1881_v0 = vmax.f32 %v1865_v44, 0.0  ;;  %3891 = vmatpush3.msra.mxu1 %v2374_v40  ;;  %v5256_v57 = vpop.trf.xlu0 }
 0x2a2   : > { %v1812_v2 = vpop.f32.mrf.mxu0  ;;  %3817 = vmatmul.mubr.f32.gmra.mxu1 %v1879_v18  ;;  %3892 = vmatprep.subr.mxu1 %v2373_v41 }
 0x2a3   : > { %v1880_v7 = vmax.f32 %v1864_v63, 0.0  ;;  %v1843_v11 = vadd.f32 %v1812_v2, %v1652_v58  ;;  %v1867_v9 = vadd.f32 %v5217_v14, %v1844_v19  ;;  %3893 = vmatpush3.msra.mxu1 %v2373_v41 }
 0x2a4   : > { %v3771_v15 = vpop.f32.mrf.mxu0 }
 0x2a5   : > { %v1866_v10 = vadd.f32 %v5217_v14, %v1843_v11  ;;  %v1846_v21 = vadd.f32 %v3771_v15, %v1667_v4  ;;  %3819 = vmatprep.mubr.f32.mxu1 %v1880_v7  ;;  %v1883_v24 = vmax.f32 %v1867_v9, 0.0  ;;  %v5273_v7 = vpop.trf.xlu0 }
 0x2a6   : > { %v1822_v3 = vpop.f32.mrf.mxu0  ;;  %3820 = vmatmul.mubr.f32.gmra.mxu1 %v1881_v0 }
 0x2a7   : > { %v1882_v12 = vmax.f32 %v1866_v10, 0.0  ;;  %v1845_v16 = vadd.f32 %v1822_v3, %v1662_v23  ;;  %v1869_v26 = vadd.f32 %v5217_v14, %v1846_v21 }
 0x2a9   : > { %v1868_v5 = vadd.f32 %v5217_v14, %v1845_v16  ;;  %3822 = vmatprep.mubr.f32.mxu1 %v1882_v12  ;;  %v1885_v38 = vmax.f32 %v1869_v26, 0.0  ;;  %v2372_v14 = vld [vmem:[#allocation14 + $0x50] sm:$0xff]  ;;  %v5285_v3 = vpop.trf.xlu0 }
 0x2aa   : > { %3823 = vmatmul.mubr.f32.gmra.mxu1 %v1883_v24  ;;  %3894 = vmatprep.subr.mxu1 %v2372_v14 }
 0x2ab   : > { %v1884_v37 = vmax.f32 %v1868_v5, 0.0  ;;  %3895 = vmatpush3.msra.mxu1 %v2372_v14 }
 0x2ac   : > { %3896 = vmatprep.subr.mxu1 %v2371_v54 }
 0x2ad   : > { %3825 = vmatprep.mubr.f32.mxu1 %v1884_v37  ;;  %3897 = vmatpush3.msra.mxu1 %v2371_v54 }
 0x2ae   : > { %3826 = vmatmul.mubr.f32.gmra.mxu1 %v1885_v38  ;;  %3898 = vmatprep.subr.mxu1 %v2370_v62  ;;  %v5293_v38 = vpop.trf.xlu0 }
 0x2af   : > { %3899 = vmatpush3.msra.mxu1 %v2370_v62 }
 0x2b0   : > { %3900 = vmatprep.subr.mxu1 %v2369_v42 }
 0x2b1   : > { %3901 = vmatpush3.msra.mxu1 %v2369_v42 }
 0x2b2   : > { %3902 = vmatprep.subr.mxu1 %v2368_v43  ;;  %v5301_v14 = vpop.trf.xlu0 }
 0x2b3   : > { %3903 = vmatpush3.msra.mxu1 %v2368_v43  ;;  %v2345_v43 = vld [vmem:[#allocation13 + $0x78] sm:$0xff] }
 0x2b4   : > { %3904 = vmatprep.subr.mxu1 %v2367_v45 }
 0x2b5   : > { %3905 = vmatpush3.msra.mxu1 %v2367_v45  ;;  %v2344_v45 = vld [vmem:[#allocation13 + $0x70] sm:$0xff] }
 0x2b6   : > { %3906 = vmatprep.subr.mxu1 %v2366_v46 }
 0x2b7   : > { %3907 = vmatpush3.msra.mxu1 %v2366_v46 }
 0x2b8   : > { %3908 = vmatprep.subr.mxu1 %v2365_v56 }
 0x2b9   : > { %3909 = vmatpush3.msra.mxu1 %v2365_v56  ;;  %v2343_v56 = vld [vmem:[#allocation13 + $0x68] sm:$0xff] }
 0x2ba   : > { %3910 = vmatprep.subr.mxu1 %v2364_v22 }
 0x2bb   : > { %3911 = vmatpush3.msra.mxu1 %v2364_v22  ;;  %v2342_v22 = vld [vmem:[#allocation13 + $0x60] sm:$0xff] }
 0x352   : > { %v3806_v48 = vpop.f32.mrf.mxu1 }
 0x353   : > { %v1981_v59 = vadd.f32 %v3806_v48, %v5244_v47 }
 0x354   : > { %v1975_v6 = vpop.f32.mrf.mxu1 }
 0x355   : > { %v5248_v49 = vadd.f32 %v1981_v59, %v5157_v8  ;;  %v1976_v51 = vadd.f32 %v5244_v47, %v1975_v6  ;;  %v2340_v59 = vld [vmem:[#allocation13 + $0x50] sm:$0xff]  ;;  %v2339_v6 = vld [vmem:[#allocation13 + $0x48] sm:$0xff] }
 0x356   : > { %v3809_v52 = vpop.f32.mrf.mxu1 }
 0x357   : > { %2071 = vst [vmem:[#allocation18 + $0x8] sm:$0xff] %v5248_v49  ;;  %v5253_v53 = vadd.f32 %v1976_v51, %v5150_v25  ;;  %v1991_v18 = vadd.f32 %v3809_v52, %v5244_v47  ;;  %v2337_v52 = vld [vmem:[#allocation13 + $0x38] sm:$0xff] }
 0x358   : > { %v1985_v44 = vpop.f32.mrf.mxu1 }
 0x359   : > { %2070 = vst [vmem:[#allocation18] sm:$0xff] %v5253_v53  ;;  %v5260_v58 = vadd.f32 %v1991_v18, %v5163_v27  ;;  %v1986_v8 = vadd.f32 %v5244_v47, %v1985_v44  ;;  %v2335_v18 = vld [vmem:[#allocation13 + $0x28] sm:$0xff] }
 0x35a   : > { %v3812_v63 = vpop.f32.mrf.mxu1 }
 0x35b   : > { %2073 = vst [vmem:[#allocation18 + $0x18] sm:$0xff] %v5260_v58  ;;  %v5265_v19 = vadd.f32 %v1986_v8, %v5159_v17  ;;  %v2001_v25 = vadd.f32 %v3812_v63, %v5244_v47  ;;  %v2332_v8 = vld [vmem:[#allocation13 + $0x10] sm:$0xff] }
 0x35c   : > { %v1995_v61 = vpop.f32.mrf.mxu1 }
 0x35d   : > { %2072 = vst [vmem:[#allocation18 + $0x10] sm:$0xff] %v5265_v19  ;;  %v5270_v2 = vadd.f32 %v2001_v25, %v5169_v50  ;;  %v1996_v4 = vadd.f32 %v5244_v47, %v1995_v61  ;;  %v2363_v25 = vld [vmem:[#allocation14 + $0x8] sm:$0xff]  ;;  %v2330_v61 = vld [vmem:[#allocation13] sm:$0xff] }
 0x35e   : > { %v3815_v27 = vpop.f32.mrf.mxu1  ;;  %3912 = vmatprep.subr.mxu1 %v2363_v25 }
 0x35f   : > { %2075 = vst [vmem:[#allocation18 + $0x28] sm:$0xff] %v5270_v2  ;;  %v5277_v11 = vadd.f32 %v1996_v4, %v5165_v28  ;;  %v2011_v17 = vadd.f32 %v3815_v27, %v5244_v47  ;;  %3913 = vmatpush3.msra.mxu1 %v2363_v25  ;;  %v2362_v4 = vld [vmem:[#allocation14] sm:$0xff]  ;;  %v5325_v27 = vld [vmem:[#allocation17 + $0x8] sm:$0xff] }
 0x360   : > { %v2005_v0 = vpop.f32.mrf.mxu1  ;;  %3914 = vmatprep.subr.mxu1 %v2362_v4 }
 0x361   : > { %2074 = vst [vmem:[#allocation18 + $0x20] sm:$0xff] %v5277_v11  ;;  %v2061_v9 = vadd.f32 %v2011_v17, %v5175_v20  ;;  %v2006_v50 = vadd.f32 %v5244_v47, %v2005_v0  ;;  %3915 = vmatpush3.msra.mxu1 %v2362_v4  ;;  %v5335_v17 = vld [vmem:[#allocation17 + $0x20] sm:$0xff]  ;;  %v5338_v0 = vld [vmem:[#allocation17 + $0x28] sm:$0xff] }
 0x362   : > { %v3818_v15 = vpop.f32.mrf.mxu1 }
 0x363   : > { %2077 = vst [vmem:[#allocation18 + $0x38] sm:$0xff] %v2061_v9  ;;  %v2060_v23 = vadd.f32 %v2006_v50, %v5171_v55  ;;  %v2021_v10 = vadd.f32 %v3818_v15, %v5244_v47  ;;  %v5344_v50 = vld [vmem:[#allocation17 + $0x38] sm:$0xff]  ;;  %v5347_v15 = vld [vmem:[#allocation17 + $0x40] sm:$0xff] }
 0x364   : > { %v2015_v21 = vpop.f32.mrf.mxu1 }
 0x365   : > { %2076 = vst [vmem:[#allocation18 + $0x30] sm:$0xff] %v2060_v23  ;;  %v2063_v28 = vadd.f32 %v2021_v10, %v5181_v30  ;;  %v2016_v12 = vadd.f32 %v5244_v47, %v2015_v21  ;;  %v5353_v10 = vld [vmem:[#allocation17 + $0x50] sm:$0xff]  ;;  %v5356_v21 = vld [vmem:[#allocation17 + $0x58] sm:$0xff] }
 0x366   : > { %v3821_v16 = vpop.f32.mrf.mxu1 }
 0x367   : > { %2079 = vst [vmem:[#allocation18 + $0x48] sm:$0xff] %v2063_v28  ;;  %v2062_v20 = vadd.f32 %v2016_v12, %v5177_v29  ;;  %v2031_v24 = vadd.f32 %v3821_v16, %v5244_v47  ;;  %v5365_v12 = vld [vmem:[#allocation17 + $0x70] sm:$0xff]  ;;  %v5368_v16 = vld [vmem:[#allocation17 + $0x78] sm:$0xff] }
 0x368   : > { %v2025_v26 = vpop.f32.mrf.mxu1 }
 0x369   : > { %2078 = vst [vmem:[#allocation18 + $0x40] sm:$0xff] %v2062_v20  ;;  %v2065_v55 = vadd.f32 %v2031_v24, %v5187_v32  ;;  %v2026_v5 = vadd.f32 %v5244_v47, %v2025_v26 }
 0x36a   : > { %v3824_v37 = vpop.f32.mrf.mxu1 }
 0x36b   : > { %2081 = vst [vmem:[#allocation18 + $0x58] sm:$0xff] %v2065_v55  ;;  %v2064_v30 = vadd.f32 %v2026_v5, %v5183_v31  ;;  %v2041_v1 = vadd.f32 %v3824_v37, %v5244_v47  ;;  %v2720_v37 = vld [vmem:[#allocation16 + $0x68] sm:$0xff] }
 0x36c   : > { %v2035_v13 = vpop.f32.mrf.mxu1 }
 0x36d   : > { %2080 = vst [vmem:[#allocation18 + $0x50] sm:$0xff] %v2064_v30  ;;  %v2067_v29 = vadd.f32 %v2041_v1, %v5193_v34  ;;  %v2036_v60 = vadd.f32 %v5244_v47, %v2035_v13  ;;  %v2124_v34 = vpop.trf.xlu0  ;;  %v2718_v13 = vld [vmem:[#allocation16 + $0x58] sm:$0xff] }
 0x36e   : > { %v3827_v39 = vpop.f32.mrf.mxu1 }
 0x36f   : > { %2083 = vst [vmem:[#allocation18 + $0x68] sm:$0xff] %v2067_v29  ;;  %v2066_v32 = vadd.f32 %v2036_v60, %v5189_v33  ;;  %v2051_v40 = vadd.f32 %v3827_v39, %v5244_v47  ;;  %v2717_v60 = vld [vmem:[#allocation16 + $0x50] sm:$0xff] }
 0x370   : > { %v2045_v41 = vpop.f32.mrf.mxu1 }
 0x371   : > { %2082 = vst [vmem:[#allocation18 + $0x60] sm:$0xff] %v2066_v32  ;;  %v2069_v31 = vadd.f32 %v2051_v40, %v5199_v36  ;;  %v2046_v54 = vadd.f32 %v5244_v47, %v2045_v41  ;;  %v2125_v33 = vpop.trf.xlu0  ;;  %v2341_v47 = vld [vmem:[#allocation13 + $0x58] sm:$0xff]  ;;  %v2715_v41 = vld [vmem:[#allocation16 + $0x40] sm:$0xff] }
 0x373   : > { %2085 = vst [vmem:[#allocation18 + $0x78] sm:$0xff] %v2069_v31  ;;  %v2068_v62 = vadd.f32 %v2046_v54, %v5195_v35  ;;  %3828 = vmatprep.subr.mxu0 %v2069_v31 }
 0x374   : > { %3829 = vmatpush3.msra.mxu0 %v2069_v31  ;;  %v2714_v31 = vld [vmem:[#allocation16 + $0x38] sm:$0xff] }
 0x375   : > { %2084 = vst [vmem:[#allocation18 + $0x70] sm:$0xff] %v2068_v62  ;;  %3830 = vmatprep.subr.mxu0 %v2068_v62  ;;  %v2126_v35 = vpop.trf.xlu0 }
 0x376   : > { %3831 = vmatpush3.msra.mxu0 %v2068_v62  ;;  %v2713_v62 = vld [vmem:[#allocation16 + $0x30] sm:$0xff] }
 0x377   : > { %3832 = vmatprep.subr.mxu0 %v2067_v29 }
 0x378   : > { %3833 = vmatpush3.msra.mxu0 %v2067_v29 }
 0x379   : > { %3834 = vmatprep.subr.mxu0 %v2066_v32  ;;  %v2127_v36 = vpop.trf.xlu0 }
 0x37a   : > { %3835 = vmatpush3.msra.mxu0 %v2066_v32  ;;  %v2716_v32 = vld [vmem:[#allocation16 + $0x48] sm:$0xff] }
 0x37b   : > { %3836 = vmatprep.subr.mxu0 %v2065_v55 }
 0x37c   : > { %3837 = vmatpush3.msra.mxu0 %v2065_v55  ;;  %v2721_v55 = vld [vmem:[#allocation16 + $0x70] sm:$0xff] }
 0x37d   : > { %3838 = vmatprep.subr.mxu0 %v2064_v30  ;;  %v2128_v42 = vpop.trf.xlu0 }
 0x37e   : > { %3839 = vmatpush3.msra.mxu0 %v2064_v30  ;;  %v2719_v30 = vld [vmem:[#allocation16 + $0x60] sm:$0xff] }
 0x37f   : > { %3840 = vmatprep.subr.mxu0 %v2063_v28 }
 0x380   : > { %3841 = vmatpush3.msra.mxu0 %v2063_v28  ;;  %v5362_v28 = vld [vmem:[#allocation17 + $0x68] sm:$0xff] }
 0x381   : > { %3842 = vmatprep.subr.mxu0 %v2062_v20  ;;  %v2129_v46 = vpop.trf.xlu0 }
 0x382   : > { %3843 = vmatpush3.msra.mxu0 %v2062_v20  ;;  %v2722_v20 = vld [vmem:[#allocation16 + $0x78] sm:$0xff] }
 0x383   : > { %3844 = vmatprep.subr.mxu0 %v2061_v9  ;;  %3996 = vmatprep.subr.mxu1 %v2722_v20 }
 0x384   : > { %3845 = vmatpush3.msra.mxu0 %v2061_v9  ;;  %v5341_v9 = vld [vmem:[#allocation17 + $0x30] sm:$0xff] }
 0x385   : > { %3846 = vmatprep.subr.mxu0 %v2060_v23  ;;  %v2130_v48 = vpop.trf.xlu0 }
 0x386   : > { %3847 = vmatpush3.msra.mxu0 %v2060_v23  ;;  %v5350_v23 = vld [vmem:[#allocation17 + $0x48] sm:$0xff] }
 0x387   : > { %3848 = vmatprep.subr.mxu0 %v5270_v2 }
 0x388   : > { %3849 = vmatpush3.msra.mxu0 %v5270_v2  ;;  %v5323_v2 = vld [vmem:[#allocation17] sm:$0xff] }
 0x389   : > { %3850 = vmatprep.subr.mxu0 %v5277_v11  ;;  %v2131_v51 = vpop.trf.xlu0 }
 0x38a   : > { %3851 = vmatpush3.msra.mxu0 %v5277_v11  ;;  %v5332_v11 = vld [vmem:[#allocation17 + $0x18] sm:$0xff] }
 0x38b   : > { %3852 = vmatprep.subr.mxu0 %v5260_v58 }
 0x38c   : > { %3853 = vmatpush3.msra.mxu0 %v5260_v58  ;;  %v2333_v58 = vld [vmem:[#allocation13 + $0x18] sm:$0xff] }
 0x38d   : > { %3854 = vmatprep.subr.mxu0 %v5265_v19  ;;  %v2132_v44 = vpop.trf.xlu0 }
 0x38e   : > { %3855 = vmatpush3.msra.mxu0 %v5265_v19  ;;  %v2331_v19 = vld [vmem:[#allocation13 + $0x8] sm:$0xff] }
 0x38f   : > { %3856 = vmatprep.subr.mxu0 %v5248_v49 }
 0x390   : > { %3857 = vmatpush3.msra.mxu0 %v5248_v49  ;;  %v2338_v49 = vld [vmem:[#allocation13 + $0x40] sm:$0xff] }
 0x391   : > { %3858 = vmatprep.subr.mxu0 %v5253_v53  ;;  %v2133_v63 = vpop.trf.xlu0 }
 0x392   : > { %3859 = vmatpush3.msra.mxu0 %v5253_v53  ;;  %v2336_v53 = vld [vmem:[#allocation13 + $0x30] sm:$0xff] }
 0x393   : > { %3861 = vmatmul.mubr.f32.vlgmr.msra.gmra.mxu0 %v5256_v57  ;;  %3940 = vmatprep.subr.mxu0 %v2345_v43  ;;  %v2334_v57 = vld [vmem:[#allocation13 + $0x20] sm:$0xff] }
 0x394   : > { %3863 = vmatprep.mubr.f32.mxu0 %v5273_v7  ;;  %3941 = vmatpush3.msra.mxu0 %v2345_v43  ;;  %v5329_v7 = vld [vmem:[#allocation17 + $0x10] sm:$0xff] }
 0x395   : > { %3942 = vmatprep.subr.mxu0 %v2344_v45 }
 0x396   : > { %3943 = vmatpush3.msra.mxu0 %v2344_v45 }
 0x397   : > { %3864 = vmatmul.mubr.f32.gmra.mxu0 %v5285_v3  ;;  %3944 = vmatprep.subr.mxu0 %v2343_v56  ;;  %v5359_v3 = vld [vmem:[#allocation17 + $0x60] sm:$0xff] }
 0x398   : > { %3866 = vmatprep.mubr.f32.mxu0 %v5293_v38  ;;  %3945 = vmatpush3.msra.mxu0 %v2343_v56  ;;  %v2710_v56 = vld [vmem:[#allocation16 + $0x18] sm:$0xff] }
 0x399   : > { %3946 = vmatprep.subr.mxu0 %v2342_v22 }
 0x39a   : > { %3947 = vmatpush3.msra.mxu0 %v2342_v22  ;;  %v2709_v22 = vld [vmem:[#allocation16 + $0x10] sm:$0xff] }
 0x39b   : > { %3867 = vmatmul.mubr.f32.gmra.mxu0 %v5301_v14  ;;  %3948 = vmatprep.subr.mxu0 %v2341_v47 }
 0x39c   : > { %3869 = vmatprep.mubr.f32.mxu0 %v2124_v34  ;;  %3949 = vmatpush3.msra.mxu0 %v2341_v47  ;;  %v2708_v47 = vld [vmem:[#allocation16 + $0x8] sm:$0xff] }
 0x39d   : > { %3950 = vmatprep.subr.mxu0 %v2340_v59 }
 0x39e   : > { %3951 = vmatpush3.msra.mxu0 %v2340_v59 }
 0x39f   : > { %3870 = vmatmul.mubr.f32.gmra.mxu0 %v2125_v33  ;;  %3952 = vmatprep.subr.mxu0 %v2339_v6  ;;  %v2712_v33 = vld [vmem:[#allocation16 + $0x28] sm:$0xff] }
 0x3a0   : > { %3872 = vmatprep.mubr.f32.mxu0 %v2126_v35  ;;  %3953 = vmatpush3.msra.mxu0 %v2339_v6 }
 0x3a1   : > { %3954 = vmatprep.subr.mxu0 %v2338_v49 }
 0x3a2   : > { %3955 = vmatpush3.msra.mxu0 %v2338_v49 }
 0x3a3   : > { %3873 = vmatmul.mubr.f32.gmra.mxu0 %v2127_v36  ;;  %3956 = vmatprep.subr.mxu0 %v2337_v52 }
 0x3a4   : > { %3875 = vmatprep.mubr.f32.mxu0 %v2128_v42  ;;  %3957 = vmatpush3.msra.mxu0 %v2337_v52 }
 0x3a5   : > { %3958 = vmatprep.subr.mxu0 %v2336_v53 }
 0x3a6   : > { %3959 = vmatpush3.msra.mxu0 %v2336_v53 }
 0x3a7   : > { %3876 = vmatmul.mubr.f32.gmra.mxu0 %v2129_v46  ;;  %3960 = vmatprep.subr.mxu0 %v2335_v18  ;;  %v2711_v46 = vld [vmem:[#allocation16 + $0x20] sm:$0xff] }
 0x3a8   : > { %3878 = vmatprep.mubr.f32.mxu0 %v2130_v48  ;;  %3961 = vmatpush3.msra.mxu0 %v2335_v18  ;;  %v2707_v48 = vld [vmem:[#allocation16] sm:$0xff] }
 0x3a9   : > { %3962 = vmatprep.subr.mxu0 %v2334_v57 }
 0x3aa   : > { %3963 = vmatpush3.msra.mxu0 %v2334_v57 }
 0x3ab   : > { %3879 = vmatmul.mubr.f32.gmra.mxu0 %v2131_v51  ;;  %3964 = vmatprep.subr.mxu0 %v2333_v58 }
 0x3ac   : > { %3881 = vmatprep.mubr.f32.mxu0 %v2132_v44  ;;  %3965 = vmatpush3.msra.mxu0 %v2333_v58 }
 0x3ad   : > { %3966 = vmatprep.subr.mxu0 %v2332_v8 }
 0x3ae   : > { %3967 = vmatpush3.msra.mxu0 %v2332_v8  ;;  %v5374_v8 = vld [vmem:[%s5484_s12] ss:$0 sm:$0xff] }
 0x3af   : > { %3882 = vmatmul.mubr.f32.gmra.mxu0 %v2133_v63  ;;  %3968 = vmatprep.subr.mxu0 %v2331_v19 }
 0x3b0   : > { %3969 = vmatpush3.msra.mxu0 %v2331_v19  ;;  %3972 = vmatprep.mubr.f32.mxu0 %v5323_v2 }
 0x3b1   : > { %3970 = vmatprep.subr.mxu0 %v2330_v61 }
 0x3b2   : > { %3971 = vmatpush3.msra.mxu0 %v2330_v61 }
 0x3b3   : > { %3973 = vmatmul.mubr.f32.vlgmr.msra.gmra.mxu0 %v5325_v27 }
 0x3b4   : > { %3975 = vmatprep.mubr.f32.mxu0 %v5329_v7 }
 0x3b7   : > { %3976 = vmatmul.mubr.f32.gmra.mxu0 %v5332_v11 }
 0x3b8   : > { %3978 = vmatprep.mubr.f32.mxu0 %v5335_v17 }
 0x3bb   : > { %3979 = vmatmul.mubr.f32.gmra.mxu0 %v5338_v0 }
 0x3bc   : > { %3981 = vmatprep.mubr.f32.mxu0 %v5341_v9 }
 0x3bf   : > { %3982 = vmatmul.mubr.f32.gmra.mxu0 %v5344_v50 }
 0x3c0   : > { %3984 = vmatprep.mubr.f32.mxu0 %v5347_v15 }
 0x3c3   : > { %3985 = vmatmul.mubr.f32.gmra.mxu0 %v5350_v23 }
 0x3c4   : > { %3987 = vmatprep.mubr.f32.mxu0 %v5353_v10 }
 0x3c7   : > { %3988 = vmatmul.mubr.f32.gmra.mxu0 %v5356_v21 }
 0x3c8   : > { %3990 = vmatprep.mubr.f32.mxu0 %v5359_v3 }
 0x3cb   : > { %3991 = vmatmul.mubr.f32.gmra.mxu0 %v5362_v28 }
 0x3cc   : > { %3993 = vmatprep.mubr.f32.mxu0 %v5365_v12 }
 0x3cf   : > { %3994 = vmatmul.mubr.f32.gmra.mxu0 %v5368_v16 }
 0x453   : > { %v3862_v24 = vpop.f32.mrf.mxu0 }
 0x455   : > { %v2200_v26 = vpop.f32.mrf.mxu0 }
 0x456   : > { %3916 = vmatprep.mubr.f32.mxu1 %v2200_v26 }
 0x457   : > { %v3865_v5 = vpop.f32.mrf.mxu0  ;;  %3917 = vmatmul.mubr.f32.vlgmr.msra.gmra.mxu1 %v3862_v24 }
 0x458   : > { %3997 = vmatpush3.msra.mxu1 %v2722_v20 }
 0x459   : > { %v2210_v38 = vpop.f32.mrf.mxu0  ;;  %3998 = vmatprep.subr.mxu1 %v2721_v55 }
 0x45a   : > { %3919 = vmatprep.mubr.f32.mxu1 %v2210_v38  ;;  %3999 = vmatpush3.msra.mxu1 %v2721_v55 }
 0x45b   : > { %v3868_v1 = vpop.f32.mrf.mxu0  ;;  %3920 = vmatmul.mubr.f32.gmra.mxu1 %v3865_v5  ;;  %4000 = vmatprep.subr.mxu1 %v2720_v37 }
 0x45c   : > { %4001 = vmatpush3.msra.mxu1 %v2720_v37 }
 0x45d   : > { %v2220_v29 = vpop.f32.mrf.mxu0  ;;  %4002 = vmatprep.subr.mxu1 %v2719_v30 }
 0x45e   : > { %3922 = vmatprep.mubr.f32.mxu1 %v2220_v29  ;;  %4003 = vmatpush3.msra.mxu1 %v2719_v30 }
 0x45f   : > { %v3871_v39 = vpop.f32.mrf.mxu0  ;;  %3923 = vmatmul.mubr.f32.gmra.mxu1 %v3868_v1  ;;  %4004 = vmatprep.subr.mxu1 %v2718_v13 }
 0x460   : > { %4005 = vmatpush3.msra.mxu1 %v2718_v13 }
 0x461   : > { %v2230_v40 = vpop.f32.mrf.mxu0  ;;  %4006 = vmatprep.subr.mxu1 %v2717_v60 }
 0x462   : > { %3925 = vmatprep.mubr.f32.mxu1 %v2230_v40  ;;  %4007 = vmatpush3.msra.mxu1 %v2717_v60 }
 0x463   : > { %v3874_v14 = vpop.f32.mrf.mxu0  ;;  %3926 = vmatmul.mubr.f32.gmra.mxu1 %v3871_v39  ;;  %4008 = vmatprep.subr.mxu1 %v2716_v32 }
 0x464   : > { %4009 = vmatpush3.msra.mxu1 %v2716_v32 }
 0x465   : > { %v2240_v54 = vpop.f32.mrf.mxu0  ;;  %4010 = vmatprep.subr.mxu1 %v2715_v41 }
 0x466   : > { %3928 = vmatprep.mubr.f32.mxu1 %v2240_v54  ;;  %4011 = vmatpush3.msra.mxu1 %v2715_v41 }
 0x467   : > { %v3877_v34 = vpop.f32.mrf.mxu0  ;;  %3929 = vmatmul.mubr.f32.gmra.mxu1 %v3874_v14  ;;  %4012 = vmatprep.subr.mxu1 %v2714_v31 }
 0x468   : > { %4013 = vmatpush3.msra.mxu1 %v2714_v31 }
 0x469   : > { %v2250_v35 = vpop.f32.mrf.mxu0  ;;  %4014 = vmatprep.subr.mxu1 %v2713_v62 }
 0x46a   : > { %3931 = vmatprep.mubr.f32.mxu1 %v2250_v35  ;;  %4015 = vmatpush3.msra.mxu1 %v2713_v62 }
 0x46b   : > { %v3880_v36 = vpop.f32.mrf.mxu0  ;;  %3932 = vmatmul.mubr.f32.gmra.mxu1 %v3877_v34  ;;  %4016 = vmatprep.subr.mxu1 %v2712_v33 }
 0x46c   : > { %4017 = vmatpush3.msra.mxu1 %v2712_v33 }
 0x46d   : > { %v2260_v42 = vpop.f32.mrf.mxu0  ;;  %4018 = vmatprep.subr.mxu1 %v2711_v46 }
 0x46e   : > { %3934 = vmatprep.mubr.f32.mxu1 %v2260_v42  ;;  %4019 = vmatpush3.msra.mxu1 %v2711_v46 }
 0x46f   : > { %v3883_v43 = vpop.f32.mrf.mxu0  ;;  %3935 = vmatmul.mubr.f32.gmra.mxu1 %v3880_v36  ;;  %4020 = vmatprep.subr.mxu1 %v2710_v56 }
 0x470   : > { %4021 = vmatpush3.msra.mxu1 %v2710_v56 }
 0x471   : > { %v2270_v45 = vpop.f32.mrf.mxu0  ;;  %4022 = vmatprep.subr.mxu1 %v2709_v22 }
 0x472   : > { %3937 = vmatprep.mubr.f32.mxu1 %v2270_v45  ;;  %4023 = vmatpush3.msra.mxu1 %v2709_v22 }
 0x473   : > { %3938 = vmatmul.mubr.f32.gmra.mxu1 %v3883_v43  ;;  %4024 = vmatprep.subr.mxu1 %v2708_v47  ;;  %v3974_v59 = vpop.f32.mrf.mxu0 }
 0x474   : > { %4025 = vmatpush3.msra.mxu1 %v2708_v47 }
 0x475   : > { %4026 = vmatprep.subr.mxu1 %v2707_v48  ;;  %v2589_v6 = vpop.f32.mrf.mxu0 }
 0x476   : > { %4027 = vmatpush3.msra.mxu1 %v2707_v48 }
 0x477   : > { %v3977_v49 = vpop.f32.mrf.mxu0 }
 0x479   : > { %v2599_v51 = vpop.f32.mrf.mxu0 }
 0x47b   : > { %v3980_v52 = vpop.f32.mrf.mxu0 }
 0x47d   : > { %v2609_v53 = vpop.f32.mrf.mxu0 }
 0x47f   : > { %v3983_v18 = vpop.f32.mrf.mxu0 }
 0x481   : > { %v2619_v44 = vpop.f32.mrf.mxu0 }
 0x483   : > { %v3986_v19 = vpop.f32.mrf.mxu0 }
 0x485   : > { %v2629_v55 = vpop.f32.mrf.mxu0 }
 0x487   : > { %v3989_v39 = vpop.f32.mrf.mxu0 }
 0x489   : > { %v2639_v33 = vpop.f32.mrf.mxu0 }
 0x48b   : > { %v3992_v47 = vpop.f32.mrf.mxu0 }
 0x517   : > { %v3918_v57 = vpop.f32.mrf.mxu1 }
 0x518   : > { %v2595_v58 = vadd.f32 %v3974_v59, %v3918_v57 }
 0x519   : > { %v2444_v63 = vpop.f32.mrf.mxu1 }
 0x51a   : > { %v2590_v25 = vadd.f32 %v2589_v6, %v2444_v63  ;;  %v2676_v61 = vadd.f32 %v5374_v8, %v2595_v58 }
 0x51b   : > { %v3921_v4 = vpop.f32.mrf.mxu1 }
 0x51c   : > { %v2675_v20 = vadd.f32 %v5374_v8, %v2590_v25  ;;  %v2605_v24 = vadd.f32 %v3977_v49, %v3921_v4  ;;  %v2692_v38 = vmax.f32 %v2676_v61, 0.0 }
 0x51d   : > { %v2454_v26 = vpop.f32.mrf.mxu1 }
 0x51e   : > { %v2691_v5 = vmax.f32 %v2675_v20, 0.0  ;;  %v2600_v37 = vadd.f32 %v2599_v51, %v2454_v26  ;;  %v2678_v30 = vadd.f32 %v5374_v8, %v2605_v24 }
 0x51f   : > { %v3924_v1 = vpop.f32.mrf.mxu1 }
 0x520   : > { %v2677_v13 = vadd.f32 %v5374_v8, %v2600_v37  ;;  %v2615_v29 = vadd.f32 %v3980_v52, %v3924_v1  ;;  %4028 = vmatprep.mubr.f32.mxu1 %v2691_v5  ;;  %v2694_v41 = vmax.f32 %v2678_v30, 0.0 }
 0x521   : > { %v2464_v60 = vpop.f32.mrf.mxu1  ;;  %4029 = vmatmul.mubr.f32.vlgmr.msra.gmra.mxu1 %v2692_v38 }
 0x522   : > { %v2693_v32 = vmax.f32 %v2677_v13, 0.0  ;;  %v2610_v40 = vadd.f32 %v2609_v53, %v2464_v60  ;;  %v2680_v14 = vadd.f32 %v5374_v8, %v2615_v29 }
 0x523   : > { %v3927_v31 = vpop.f32.mrf.mxu1 }
 0x524   : > { %v2679_v54 = vadd.f32 %v5374_v8, %v2610_v40  ;;  %v2625_v62 = vadd.f32 %v3983_v18, %v3927_v31  ;;  %4031 = vmatprep.mubr.f32.mxu1 %v2693_v32  ;;  %v2696_v42 = vmax.f32 %v2680_v14, 0.0 }
 0x525   : > { %v2474_v34 = vpop.f32.mrf.mxu1  ;;  %4032 = vmatmul.mubr.f32.gmra.mxu1 %v2694_v41 }
 0x526   : > { %v2695_v35 = vmax.f32 %v2679_v54, 0.0  ;;  %v2620_v36 = vadd.f32 %v2619_v44, %v2474_v34  ;;  %v2682_v43 = vadd.f32 %v5374_v8, %v2625_v62  ;;  %v2649_v44 = vpop.f32.mrf.mxu0 }
 0x527   : > { %v3930_v45 = vpop.f32.mrf.mxu1 }
 0x528   : > { %v2681_v46 = vadd.f32 %v5374_v8, %v2620_v36  ;;  %v2635_v56 = vadd.f32 %v3986_v19, %v3930_v45  ;;  %4034 = vmatprep.mubr.f32.mxu1 %v2695_v35  ;;  %v2698_v6 = vmax.f32 %v2682_v43, 0.0  ;;  %v3995_v24 = vpop.f32.mrf.mxu0 }
 0x529   : > { %v2484_v22 = vpop.f32.mrf.mxu1  ;;  %4035 = vmatmul.mubr.f32.gmra.mxu1 %v2696_v42 }
 0x52a   : > { %v2697_v48 = vmax.f32 %v2681_v46, 0.0  ;;  %v2630_v59 = vadd.f32 %v2629_v55, %v2484_v22  ;;  %v2684_v49 = vadd.f32 %v5374_v8, %v2635_v56  ;;  %v2659_v13 = vpop.f32.mrf.mxu0 }
 0x52b   : > { %v3933_v51 = vpop.f32.mrf.mxu1 }
 0x52c   : > { %v2683_v52 = vadd.f32 %v5374_v8, %v2630_v59  ;;  %v2645_v53 = vadd.f32 %v3989_v39, %v3933_v51  ;;  %4037 = vmatprep.mubr.f32.mxu1 %v2697_v48  ;;  %v2700_v63 = vmax.f32 %v2684_v49, 0.0 }
 0x52d   : > { %v2494_v18 = vpop.f32.mrf.mxu1  ;;  %4038 = vmatmul.mubr.f32.gmra.mxu1 %v2698_v6 }
 0x52e   : > { %v2699_v57 = vmax.f32 %v2683_v52, 0.0  ;;  %v2640_v58 = vadd.f32 %v2639_v33, %v2494_v18  ;;  %v2686_v19 = vadd.f32 %v5374_v8, %v2645_v53 }
 0x52f   : > { %v3936_v25 = vpop.f32.mrf.mxu1 }
 0x530   : > { %v2685_v61 = vadd.f32 %v5374_v8, %v2640_v58  ;;  %v2655_v4 = vadd.f32 %v3992_v47, %v3936_v25  ;;  %4040 = vmatprep.mubr.f32.mxu1 %v2699_v57  ;;  %v2702_v5 = vmax.f32 %v2686_v19, 0.0 }
 0x531   : > { %v2504_v20 = vpop.f32.mrf.mxu1  ;;  %4041 = vmatmul.mubr.f32.gmra.mxu1 %v2700_v63 }
 0x532   : > { %v2701_v26 = vmax.f32 %v2685_v61, 0.0  ;;  %v2650_v55 = vadd.f32 %v2649_v44, %v2504_v20  ;;  %v2688_v37 = vadd.f32 %v5374_v8, %v2655_v4 }
 0x533   : > { %v3939_v38 = vpop.f32.mrf.mxu1 }
 0x534   : > { %v2687_v30 = vadd.f32 %v5374_v8, %v2650_v55  ;;  %v2665_v1 = vadd.f32 %v3995_v24, %v3939_v38  ;;  %4043 = vmatprep.mubr.f32.mxu1 %v2701_v26  ;;  %v2704_v32 = vmax.f32 %v2688_v37, 0.0 }
 0x535   : > { %v2514_v29 = vpop.f32.mrf.mxu1  ;;  %4044 = vmatmul.mubr.f32.gmra.mxu1 %v2702_v5 }
 0x536   : > { %v2703_v60 = vmax.f32 %v2687_v30, 0.0  ;;  %v2660_v39 = vadd.f32 %v2659_v13, %v2514_v29  ;;  %v2690_v40 = vadd.f32 %v5374_v8, %v2665_v1 }
 0x538   : > { %v2689_v41 = vadd.f32 %v5374_v8, %v2660_v39  ;;  %4046 = vmatprep.mubr.f32.mxu1 %v2703_v60  ;;  %v2706_v31 = vmax.f32 %v2690_v40, 0.0 }
 0x539   : > { %4047 = vmatmul.mubr.f32.gmra.mxu1 %v2704_v32 }
 0x53a   : > { %v2705_v14 = vmax.f32 %v2689_v41, 0.0 }
 0x53c   : > { %4049 = vmatprep.mubr.f32.mxu1 %v2705_v14 }
 0x53d   : > { %4050 = vmatmul.mubr.f32.gmra.mxu1 %v2706_v31 }
 0x53e   : > { %4365 = shalt.err (!%p4362_p11)
}
 0x53f   : > { %s4461_s28 = smov 128   ;;  %s4462_s5 = smov 8   ;;  %v5411_v8 = vld [vmem:[%s5486_s14] ss:$0 sm:$0xff] }
 0x540   : > { %4083 = dma.vmem_to_hbm [thread:$0]  (%p5394_p2), %s2927_s27, 2048, %s5488_s16, [#allocation19], %s4461_s28, %s4461_s28, %s4462_s5  }
 0x541   : > { %s4463_s15 = smov [#allocation17]  }
 0x542   : > { %s2913_s17 = sshll.u32 %s4463_s15, 4  ;;  %s2914_s17 = int_to_ptr.vmem [resolvable:$true] %s2913_s17 }
 0x543   : > { %s4376_s20 = scalar_lea.vmem %s2914_s17, 2048  ;;  %p4383_p1 = scmp.lt.s32.totalorder %s2914_s17, %s2914_s17 }
 0x544   : > { %p4377_p12 = scmp.ne.s32.totalorder %s2914_s17, %s4376_s20  ;;  %p4384_p4 = scmp.lt.s32.totalorder %s4376_s20, %s4376_s20 }
 0x546   : > { %p4378_p13 = pnand %p4377_p12, %p5394_p2  ;;  %p4385_p3 = por %p4384_p4, %p4383_p1 }
 0x548   : > { %p4379_p0 = pneg %p4378_p13 }
 0x54a   : > { %p4386_p5 = pnand %p4385_p3, %p4379_p0 }
 0x5e1   : > { %v4030_v54 = vpop.f32.mrf.mxu1 }
 0x5e2   : > { %v2802_v62 = vadd.f32 %v4030_v54, %v5411_v8 }
 0x5e3   : > { %v2796_v34 = vpop.f32.mrf.mxu1 }
 0x5e4   : > { %v2876_v33 = vadd.f32 %v2802_v62, %v5325_v27  ;;  %v2797_v35 = vadd.f32 %v5411_v8, %v2796_v34 }
 0x5e5   : > { %v4033_v36 = vpop.f32.mrf.mxu1 }
 0x5e6   : > { %2892 = vst [vmem:[#allocation17 + $0x8] sm:$0xff] %v2876_v33  ;;  %v2875_v42 = vadd.f32 %v2797_v35, %v5323_v2  ;;  %v2812_v43 = vadd.f32 %v4033_v36, %v5411_v8 }
 0x5e7   : > { %v2806_v45 = vpop.f32.mrf.mxu1 }
 0x5e8   : > { %2891 = vst [vmem:[#allocation17] sm:$0xff] %v2875_v42  ;;  %v2878_v46 = vadd.f32 %v2812_v43, %v5332_v11  ;;  %v2807_v56 = vadd.f32 %v5411_v8, %v2806_v45 }
 0x5e9   : > { %v4036_v22 = vpop.f32.mrf.mxu1 }
 0x5ea   : > { %2894 = vst [vmem:[#allocation17 + $0x18] sm:$0xff] %v2878_v46  ;;  %v2877_v47 = vadd.f32 %v2807_v56, %v5329_v7  ;;  %v2822_v27 = vadd.f32 %v4036_v22, %v5411_v8 }
 0x5eb   : > { %v2816_v48 = vpop.f32.mrf.mxu1 }
 0x5ec   : > { %2893 = vst [vmem:[#allocation17 + $0x10] sm:$0xff] %v2877_v47  ;;  %v2880_v59 = vadd.f32 %v2822_v27, %v5338_v0  ;;  %v2817_v2 = vadd.f32 %v5411_v8, %v2816_v48 }
 0x5ed   : > { %v4039_v6 = vpop.f32.mrf.mxu1 }
 0x5ee   : > { %2896 = vst [vmem:[#allocation17 + $0x28] sm:$0xff] %v2880_v59  ;;  %v2879_v49 = vadd.f32 %v2817_v2, %v5335_v17  ;;  %v2832_v11 = vadd.f32 %v4039_v6, %v5411_v8 }
 0x5ef   : > { %v2826_v51 = vpop.f32.mrf.mxu1 }
 0x5f0   : > { %2895 = vst [vmem:[#allocation17 + $0x20] sm:$0xff] %v2879_v49  ;;  %v2882_v52 = vadd.f32 %v2832_v11, %v5344_v50  ;;  %v2827_v7 = vadd.f32 %v5411_v8, %v2826_v51 }
 0x5f1   : > { %v4042_v53 = vpop.f32.mrf.mxu1 }
 0x5f2   : > { %2898 = vst [vmem:[#allocation17 + $0x38] sm:$0xff] %v2882_v52  ;;  %v2881_v18 = vadd.f32 %v2827_v7, %v5341_v9  ;;  %v2842_v0 = vadd.f32 %v4042_v53, %v5411_v8 }
 0x5f3   : > { %v2836_v44 = vpop.f32.mrf.mxu1 }
 0x5f4   : > { %2897 = vst [vmem:[#allocation17 + $0x30] sm:$0xff] %v2881_v18  ;;  %v2884_v57 = vadd.f32 %v2842_v0, %v5350_v23  ;;  %v2837_v17 = vadd.f32 %v5411_v8, %v2836_v44 }
 0x5f5   : > { %v4045_v58 = vpop.f32.mrf.mxu1 }
 0x5f6   : > { %2900 = vst [vmem:[#allocation17 + $0x48] sm:$0xff] %v2884_v57  ;;  %v2883_v63 = vadd.f32 %v2837_v17, %v5347_v15  ;;  %v2852_v50 = vadd.f32 %v4045_v58, %v5411_v8 }
 0x5f7   : > { %v2846_v19 = vpop.f32.mrf.mxu1 }
 0x5f8   : > { %2899 = vst [vmem:[#allocation17 + $0x40] sm:$0xff] %v2883_v63  ;;  %v2886_v25 = vadd.f32 %v2852_v50, %v5356_v21  ;;  %v2847_v9 = vadd.f32 %v5411_v8, %v2846_v19 }
 0x5f9   : > { %v4048_v61 = vpop.f32.mrf.mxu1 }
 0x5fa   : > { %2902 = vst [vmem:[#allocation17 + $0x58] sm:$0xff] %v2886_v25  ;;  %v2885_v4 = vadd.f32 %v2847_v9, %v5353_v10  ;;  %v2862_v23 = vadd.f32 %v4048_v61, %v5411_v8 }
 0x5fb   : > { %v2856_v20 = vpop.f32.mrf.mxu1 }
 0x5fc   : > { %2901 = vst [vmem:[#allocation17 + $0x50] sm:$0xff] %v2885_v4  ;;  %v2888_v24 = vadd.f32 %v2862_v23, %v5362_v28  ;;  %v2857_v15 = vadd.f32 %v5411_v8, %v2856_v20 }
 0x5fd   : > { %v4051_v26 = vpop.f32.mrf.mxu1 }
 0x5fe   : > { %2904 = vst [vmem:[#allocation17 + $0x68] sm:$0xff] %v2888_v24  ;;  %v2887_v55 = vadd.f32 %v2857_v15, %v5359_v3  ;;  %v2872_v21 = vadd.f32 %v4051_v26, %v5411_v8 }
 0x5ff   : > { %v2866_v5 = vpop.f32.mrf.mxu1 }
 0x600   : > { %2903 = vst [vmem:[#allocation17 + $0x60] sm:$0xff] %v2887_v55  ;;  %v2890_v10 = vadd.f32 %v2872_v21, %v5368_v16  ;;  %v2867_v37 = vadd.f32 %v5411_v8, %v2866_v5 }
 0x602   : > { %2906 = vst [vmem:[#allocation17 + $0x78] sm:$0xff] %v2890_v10  ;;  %v2889_v28 = vadd.f32 %v2867_v37, %v5365_v12 }
 0x604   : > { %2905 = vst [vmem:[#allocation17 + $0x70] sm:$0xff] %v2889_v28 }
 0x605   : > { %4389 = shalt.err (!%p4386_p5)
}
 0x606   : > { %s5510_s0 = sld [smem:[#allocation30_spill]] }
 0x60c   : > { %4081 = dma.vmem_to_hbm [thread:$0]  (%p5394_p2), %s2914_s17, 2048, %s5510_s0, [#allocation7], %s4461_s28, %s4461_s28, %s4462_s5  }
 0x60d   : > { %4429 = dma.done.wait (%p5394_p2), [#allocation7], 2048  }
 0x60e   : > { %4431 = vsyncadd (%p5394_p2), [#allocation7], 4294965248 }
 0x60f   : > { %4433 = dma.done.wait (%p5394_p2), [#allocation19], 2048  }
 0x610   : > { %4435 = vsyncadd (%p5394_p2), [#allocation19], 4294965248 }
 0x611 PF: > { %s33_s23 = sadd.s32 1, %s4446_s23   ;;  %s5511_s21 = smov %s4442_s22 }
 0x612   : > { %p30_p6 = scmp.ge.s32.totalorder %s33_s23, 4   ;;  %s5512_s22 = smov %s5514_s30 }
 0x614   :  { %32 = sbr.rel (!%p30_p6) target bundleno = 13 (0xd), region = 160 }
 0x619   :  { %2946 = vsyncpa [#allocation6], 1 }
 0x61a   :  { %2948 = vsyncpa [#allocation6 + $0x1], 1 }
 0x61b   :  { %2949 = vsyncpa [#allocation9], 1 }
 0x61c   :  { %2950 = vsyncpa [#allocation12], 1 }
 0x61d   :  { %2951 = vsyncpa [#allocation15], 1 }
 0x61e   :  { %2952 = vsyncpa [#allocation7], 1 }
 0x61f   :  { %2954 = vsyncpa [#allocation7 + $0x1], 1 }
 0x620   :  { %2955 = vsyncpa [#allocation19], 1 }

</bundles_post_ra>
